<compile_context>
chip_gen: v7x
topology: tpu7x:2x2x1
jax: 0.10.0
libtpu: 0.0.40
codegen_flags: <defaults>
</compile_context>

<pallas_src>
import functools

import jax
import jax.numpy as jnp
from jax.experimental import pallas as pl
from jax.experimental.pallas import tpu as pltpu


# ----------------------------------------------------------------------------
# Kernel: streamed conv1 + pool@A accumulation, fused linear tail + log_softmax
# ----------------------------------------------------------------------------
def gating_gcn_kernel(a_ref, s_ref, x_ref, w1_ref, b1_ref, w2_ref, b2_ref,
                      wl_ref, bl_ref, icnt_ref, o_ref,
                      xw1_s, acc_s, hw2_s, sa_s):
    i = pl.program_id(0)          # A row-block index
    k = pl.program_id(1)          # A col-block index (conv1 reduction axis)
    ni = pl.num_programs(0)
    nk = pl.num_programs(1)
    tm = a_ref.shape[0]
    tk = a_ref.shape[1]

    # ---- one-time init at the first grid step -------------------------------
    @pl.when(jnp.logical_and(i == 0, k == 0))
    def _():
        sa_s[...] = jnp.zeros_like(sa_s)
        # conv1 feature transform X @ W1 (tiny), kept resident as bf16 MXU RHS.
        xw1_s[...] = jnp.dot(
            x_ref[...], w1_ref[...],
            preferred_element_type=jnp.float32).astype(xw1_s.dtype)

    # ---- per-row-block accumulator reset -------------------------------------
    @pl.when(k == 0)
    def _():
        acc_s[...] = jnp.zeros_like(acc_s)

    a_blk = a_ref[...]                                   # [tm, tk] bf16
    col = pl.multiple_of(k * tk, tk)

    # conv1 propagation: acc(row-block i) += A[i,k] @ (X @ W1)[col-block k]
    acc_s[...] += jnp.dot(a_blk, xw1_s[pl.ds(col, tk), :],
                          preferred_element_type=jnp.float32)

    # pooling hoist: SA[:, col-block k] += S[:, row-block i] @ A[i,k]
    sa_s[:, pl.ds(col, tk)] += jnp.dot(s_ref[...], a_blk,
                                       preferred_element_type=jnp.float32)

    # ---- row-block finalize: bias + ReLU + @W2 (overlaps with streamed DMA) --
    @pl.when(k == nk - 1)
    def _():
        row = pl.multiple_of(i * tm, tm)
        # F.dropout(p=0.5) is identity in eval mode.
        # TODO(synk): training-mode dropout (pltpu.prng_random_bits mask) not emitted.
        h1 = jnp.maximum(acc_s[...] + b1_ref[...], 0.0)          # [tm, H] f32
        hw2_s[pl.ds(row, tm), :] = jnp.dot(h1, w2_ref[...],
                                           preferred_element_type=jnp.float32)

    # ---- epilogue at the last grid step --------------------------------------
    @pl.when(jnp.logical_and(i == ni - 1, k == nk - 1))
    def _():
        # pooled = (S@A) @ (h1@W2) / counts + b2, then Linear, then log_softmax.
        pooled = (jnp.dot(sa_s[...], hw2_s[...],
                          preferred_element_type=jnp.float32)
                  * icnt_ref[...]) + b2_ref[...]                 # [Bp, H]
        z = jnp.dot(pooled, wl_ref[...],
                    preferred_element_type=jnp.float32) + bl_ref[...]

        m = jnp.max(z, axis=1, keepdims=True)
        zs = z - m
        lse = jnp.log(jnp.sum(jnp.exp(zs), axis=1, keepdims=True))
        o_ref[...] = zs - lse


def _round_up(v, m):
    return (v + m - 1) // m * m


@functools.partial(jax.jit, static_argnames=("num_graphs", "tile"))
def gating_gcn_forward(atomic_numbers, pos, edge_index, batch, params,
                       num_graphs, tile=None):
    n = atomic_numbers.shape[0]

    # x = cat([atomic_numbers.unsqueeze(1), pos], dim=-1)  -> [N, 4]
    x = jnp.concatenate([atomic_numbers[:, None], pos], axis=-1).astype(jnp.float32)

    # ---- XLA glue: dense symmetrically-normalized adjacency with self loops --
    src, dst = edge_index[0], edge_index[1]
    loop = jnp.arange(n, dtype=edge_index.dtype)
    src = jnp.concatenate([src, loop])
    dst = jnp.concatenate([dst, loop])
    ones = jnp.ones(src.shape[0], dtype=jnp.float32)
    deg = jnp.zeros((n,), jnp.float32).at[dst].add(ones)
    dinv = jnp.where(deg > 0, 1.0 / jnp.sqrt(deg), 0.0)
    norm = dinv[src] * dinv[dst]
    a_hat = jnp.zeros((n, n), jnp.float32).at[dst, src].add(norm)

    # ---- XLA glue: 0/1 sum-pool selector (exact in bf16) + 1/|G_b| -----------
    onehot = (batch[None, :] == jnp.arange(num_graphs)[:, None]).astype(jnp.float32)
    counts = jnp.maximum(jnp.sum(onehot, axis=1, keepdims=True), 1.0)
    inv_counts = 1.0 / counts

    w1, b1, w2, b2, wl, bl = params
    in_dim = x.shape[1]
    hidden = w1.shape[1]           # NOTE: hidden=32 uses only 32/256 MXU cols;
    num_experts = wl.shape[1]      # widening is a model-config decision.

    # ---- padding / tiling -----------------------------------------------------
    n_pad = _round_up(max(n, 128), 128)
    if tile is None:
        tile = min(512, n_pad)
    n_pad = _round_up(n_pad, tile)
    b_pad = _round_up(max(num_graphs, 8), 8)

    a_p = jnp.zeros((n_pad, n_pad), jnp.bfloat16).at[:n, :n].set(
        a_hat.astype(jnp.bfloat16))
    x_p = jnp.zeros((n_pad, in_dim), jnp.float32).at[:n, :].set(x)
    s_p = jnp.zeros((b_pad, n_pad), jnp.bfloat16).at[:num_graphs, :n].set(
        onehot.astype(jnp.bfloat16))
    icnt_p = jnp.ones((b_pad, 1), jnp.float32).at[:num_graphs, :].set(inv_counts)

    grid = (n_pad // tile, n_pad // tile)

    def _full(shape):
        return pl.BlockSpec(shape, lambda i, k: (0, 0))

    in_specs = [
        pl.BlockSpec((tile, tile), lambda i, k: (i, k)),   # A_hat (streamed)
        pl.BlockSpec((b_pad, tile), lambda i, k: (0, i)),  # sum-pool selector S
        _full((n_pad, in_dim)),                            # x (resident)
        _full((in_dim, hidden)),                           # W1
        _full((1, hidden)),                                # b1
        _full((hidden, hidden)),                           # W2
        _full((1, hidden)),                                # b2
        _full((hidden, num_experts)),                      # WL
        _full((1, num_experts)),                           # bL
        _full((b_pad, 1)),                                 # 1 / per-graph counts
    ]
    out_spec = pl.BlockSpec((b_pad, num_experts), lambda i, k: (0, 0))

    flops = int(2 * n_pad * n_pad * hidden          # A @ (X W1)
                + 2 * b_pad * n_pad * n_pad         # S @ A
                + 2 * n_pad * in_dim * hidden       # X @ W1
                + 2 * n_pad * hidden * hidden       # h1 @ W2
                + 2 * b_pad * n_pad * hidden        # SA @ (h1 W2)
                + 2 * b_pad * hidden * num_experts)
    bytes_accessed = int(a_p.size * 2 + s_p.size * 2 + x_p.size * 4
                         + (w1.size + b1.size + w2.size + b2.size
                            + wl.size + bl.size) * 4
                         + icnt_p.size * 4 + b_pad * num_experts * 4)

    out = pl.pallas_call(
        gating_gcn_kernel,
        out_shape=jax.ShapeDtypeStruct((b_pad, num_experts), jnp.float32),
        grid_spec=pltpu.PrefetchScalarGridSpec(
            num_scalar_prefetch=0,
            grid=grid,
            in_specs=in_specs,
            out_specs=out_spec,
            scratch_shapes=[
                pltpu.VMEM((n_pad, hidden), jnp.bfloat16),  # X @ W1 (MXU RHS)
                pltpu.VMEM((tile, hidden), jnp.float32),    # h1 row-block acc
                pltpu.VMEM((n_pad, hidden), jnp.float32),   # relu(h1) @ W2
                pltpu.VMEM((b_pad, n_pad), jnp.float32),    # S @ A accumulator
            ]),
        compiler_params=pltpu.CompilerParams(
            # Both axes feed whole-grid accumulators (pooling hoist) -> neither
            # can be megacore-split; see TODO at top for the parallel variant.
            dimension_semantics=("arbitrary", "arbitrary"),
            vmem_limit_bytes=32 * 1024 * 1024),
        cost_estimate=pl.CostEstimate(flops=flops,
                                      transcendentals=b_pad * num_experts,
                                      bytes_accessed=bytes_accessed),
    )(a_p, s_p, x_p, w1, b1.reshape(1, hidden), w2, b2.reshape(1, hidden),
      wl, bl.reshape(1, num_experts), icnt_p)

    return out[:num_graphs]


# ----------------------------------------------------------------------------
# Pure-JAX f32 reference (straightforward path) for sanity checking
# ----------------------------------------------------------------------------
def reference_forward(atomic_numbers, pos, edge_index, batch, params, num_graphs):
    n = atomic_numbers.shape[0]
    x = jnp.concatenate([atomic_numbers[:, None], pos], axis=-1).astype(jnp.float32)
    src, dst = edge_index[0], edge_index[1]
    loop = jnp.arange(n, dtype=edge_index.dtype)
    src = jnp.concatenate([src, loop])
    dst = jnp.concatenate([dst, loop])
    deg = jnp.zeros((n,), jnp.float32).at[dst].add(1.0)
    dinv = jnp.where(deg > 0, 1.0 / jnp.sqrt(deg), 0.0)
    norm = dinv[src] * dinv[dst]
    a_hat = jnp.zeros((n, n), jnp.float32).at[dst, src].add(norm)
    w1, b1, w2, b2, wl, bl = params
    h = jnp.maximum(a_hat @ (x @ w1) + b1, 0.0)
    h = a_hat @ (h @ w2) + b2
    z = h @ wl + bl
    onehot = (batch[None, :] == jnp.arange(num_graphs)[:, None]).astype(jnp.float32)
    pooled = (onehot / jnp.maximum(onehot.sum(1, keepdims=True), 1.0)) @ z
    return jax.nn.log_softmax(pooled, axis=1)


if __name__ == "__main__":
    key = jax.random.PRNGKey(0)

    # 2 graphs x 80 nodes -> N=160, padded to 256 with tile=128 -> 2x2 grid so
    # both accumulation axes are exercised.  input_dim=4, hidden=32, experts=4.
    num_graphs = 2
    nodes_per_graph = 80
    n_nodes = num_graphs * nodes_per_graph
    input_dim, hidden, num_experts = 4, 32, 4

    k_an, k_pos, k_w1, k_w2, k_wl = jax.random.split(key, 5)
    atomic_numbers = jax.random.randint(k_an, (n_nodes,), 1, 10).astype(jnp.float32)
    pos = jax.random.normal(k_pos, (n_nodes, 3), jnp.float32)

    # Ring graph (undirected edges) inside each graph, no cross-graph edges.
    src_list, dst_list = [], []
    for g in range(num_graphs):
        base = g * nodes_per_graph
        for i in range(nodes_per_graph):
            a_i = base + i
            b_i = base + (i + 1) % nodes_per_graph
            src_list += [a_i, b_i]
            dst_list += [b_i, a_i]
    edge_index = jnp.array([src_list, dst_list], dtype=jnp.int32)
    batch = jnp.repeat(jnp.arange(num_graphs, dtype=jnp.int32), nodes_per_graph)

    # Deterministic synthetic parameters (weights stored as [in, out]).
    params = (
        jax.random.normal(k_w1, (input_dim, hidden), jnp.float32) * 0.1,
        jnp.zeros((hidden,), jnp.float32),
        jax.random.normal(k_w2, (hidden, hidden), jnp.float32) * 0.1,
        jnp.zeros((hidden,), jnp.float32),
        jax.random.normal(k_wl, (hidden, num_experts), jnp.float32) * 0.1,
        jnp.zeros((num_experts,), jnp.float32),
    )

    out = gating_gcn_forward(atomic_numbers, pos, edge_index, batch, params,
                             num_graphs=num_graphs, tile=128)
    out = jax.block_until_ready(out)

    ref = reference_forward(atomic_numbers, pos, edge_index, batch, params,
                            num_graphs)
    assert out.shape == (num_graphs, num_experts)
    # Tolerance loosened vs the all-f32 version because A_hat / S / X@W1 are
    # bf16 on the MXU (accumulation stays f32).
    assert jnp.allclose(out, ref, atol=2e-2, rtol=2e-2), (
        f"max abs diff {jnp.max(jnp.abs(out - ref))}")

    print("KERNEL_OK")
</pallas_src>

<mosaic_0001>
module attributes {stable_mosaic.version = 11 : i64} {
  func.func private @main(%arg0: i32) attributes {dimension_semantics = [#tpu.dimension_semantics<core_parallel>], iteration_bounds = array<i64: 2>, tpu.core_type = #tpu.core_type<sc_scalar_subcore>, window_params = []} {
    return
  }
}

module attributes {stable_mosaic.version = 11 : i64} {
  func.func private @main(%arg0: i32) attributes {dimension_semantics = [#tpu.dimension_semantics<core_parallel>], iteration_bounds = array<i64: 2>, tpu.core_type = #tpu.core_type<sc_scalar_subcore>, window_params = []} {
    return
  }
}

module attributes {stable_mosaic.version = 11 : i64} {
  func.func @gating_gcn_kernel(%arg0: i32, %arg1: i32, %arg2: memref<128x128xbf16, #tpu.memory_space<vmem>>, %arg3: memref<8x128xbf16, #tpu.memory_space<vmem>>, %arg4: memref<256x4xf32, #tpu.memory_space<vmem>>, %arg5: memref<4x32xf32, #tpu.memory_space<vmem>>, %arg6: memref<1x32xf32, #tpu.memory_space<vmem>>, %arg7: memref<32x32xf32, #tpu.memory_space<vmem>>, %arg8: memref<1x32xf32, #tpu.memory_space<vmem>>, %arg9: memref<32x4xf32, #tpu.memory_space<vmem>>, %arg10: memref<1x4xf32, #tpu.memory_space<vmem>>, %arg11: memref<8x1xf32, #tpu.memory_space<vmem>>, %arg12: memref<8x4xf32, #tpu.memory_space<vmem>>, %arg13: memref<256x32xbf16, #tpu.memory_space<vmem>>, %arg14: memref<128x32xf32, #tpu.memory_space<vmem>>, %arg15: memref<256x32xf32, #tpu.memory_space<vmem>>, %arg16: memref<8x256xf32, #tpu.memory_space<vmem>>) attributes {dimension_semantics = [#tpu.dimension_semantics<arbitrary>, #tpu.dimension_semantics<arbitrary>], iteration_bounds = array<i64: 2, 2>, scalar_prefetch = 0 : i64, scratch_operands = 4 : i64, tpu.core_type = #tpu.core_type<tc>, window_params = [{transform_indices = @transform_0, window_bounds = array<i64: 128, 128>}, {transform_indices = @transform_1, window_bounds = array<i64: 8, 128>}, {pipeline_mode = #tpu.pipeline_mode<synchronous>, transform_indices = @transform_2, window_bounds = array<i64: 256, 4>}, {pipeline_mode = #tpu.pipeline_mode<synchronous>, transform_indices = @transform_3, window_bounds = array<i64: 4, 32>}, {pipeline_mode = #tpu.pipeline_mode<synchronous>, transform_indices = @transform_4, window_bounds = array<i64: 1, 32>}, {pipeline_mode = #tpu.pipeline_mode<synchronous>, transform_indices = @transform_5, window_bounds = array<i64: 32, 32>}, {pipeline_mode = #tpu.pipeline_mode<synchronous>, transform_indices = @transform_6, window_bounds = array<i64: 1, 32>}, {pipeline_mode = #tpu.pipeline_mode<synchronous>, transform_indices = @transform_7, window_bounds = array<i64: 32, 4>}, {pipeline_mode = #tpu.pipeline_mode<synchronous>, transform_indices = @transform_8, window_bounds = array<i64: 1, 4>}, {pipeline_mode = #tpu.pipeline_mode<synchronous>, transform_indices = @transform_9, window_bounds = array<i64: 8, 1>}, {pipeline_mode = #tpu.pipeline_mode<synchronous>, transform_indices = @transform_10, window_bounds = array<i64: 8, 4>}]} {
    %c0_i32 = arith.constant 0 : i32
    %0 = arith.cmpi eq, %arg0, %c0_i32 : i32
    %c0_i32_0 = arith.constant 0 : i32
    %1 = arith.cmpi eq, %arg1, %c0_i32_0 : i32
    %2 = arith.andi %0, %1 : i1
    %3 = arith.extui %2 : i1 to i32
    %c0_i32_1 = arith.constant 0 : i32
    %4 = arith.cmpi ne, %3, %c0_i32_1 : i32
    scf.if %4 {
      %cst_19 = arith.constant 0.000000e+00 : f32
      %32 = vector.broadcast %cst_19 : f32 to vector<8x256xf32>
      %c0_20 = arith.constant 0 : index
      %c0_21 = arith.constant 0 : index
      %33 = vector.load %arg16[%c0_20, %c0_21] : memref<8x256xf32, #tpu.memory_space<vmem>>, vector<8x256xf32>
      tpu.vector_store %arg16[%c0_20, %c0_21], %32 {strides = array<i32>} : memref<8x256xf32, #tpu.memory_space<vmem>>, vector<8x256xf32>,
      %c0_22 = arith.constant 0 : index
      %c0_23 = arith.constant 0 : index
      %34 = vector.load %arg4[%c0_22, %c0_23] : memref<256x4xf32, #tpu.memory_space<vmem>>, vector<256x4xf32>
      %c0_24 = arith.constant 0 : index
      %c0_25 = arith.constant 0 : index
      %35 = vector.load %arg5[%c0_24, %c0_25] : memref<4x32xf32, #tpu.memory_space<vmem>>, vector<4x32xf32>
      %cst_26 = arith.constant dense<0.000000e+00> : vector<256x32xf32>
      %36 = tpu.matmul %34, %35, %cst_26 {dimension_numbers = #tpu.dot_dimension_numbers<[1], [0], [0], [1], [0, 0, 1, 1], [], []>} : vector<256x4xf32>, vector<4x32xf32>, vector<256x32xf32> -> vector<256x32xf32>
      %37 = arith.truncf %36 : vector<256x32xf32> to vector<256x32xbf16>
      %c0_27 = arith.constant 0 : index
      %c0_28 = arith.constant 0 : index
      %38 = vector.load %arg13[%c0_27, %c0_28] : memref<256x32xbf16, #tpu.memory_space<vmem>>, vector<256x32xbf16>
      tpu.vector_store %arg13[%c0_27, %c0_28], %37 {strides = array<i32>} : memref<256x32xbf16, #tpu.memory_space<vmem>>, vector<256x32xbf16>,
    } else {
    }
    %c0_i32_2 = arith.constant 0 : i32
    %5 = arith.cmpi eq, %arg1, %c0_i32_2 : i32
    %6 = arith.extui %5 : i1 to i32
    %c0_i32_3 = arith.constant 0 : i32
    %7 = arith.cmpi ne, %6, %c0_i32_3 : i32
    scf.if %7 {
      %cst_19 = arith.constant 0.000000e+00 : f32
      %32 = vector.broadcast %cst_19 : f32 to vector<128x32xf32>
      %c0_20 = arith.constant 0 : index
      %c0_21 = arith.constant 0 : index
      %33 = vector.load %arg14[%c0_20, %c0_21] : memref<128x32xf32, #tpu.memory_space<vmem>>, vector<128x32xf32>
      tpu.vector_store %arg14[%c0_20, %c0_21], %32 {strides = array<i32>} : memref<128x32xf32, #tpu.memory_space<vmem>>, vector<128x32xf32>,
    } else {
    }
    %c0 = arith.constant 0 : index
    %c0_4 = arith.constant 0 : index
    %8 = vector.load %arg2[%c0, %c0_4] : memref<128x128xbf16, #tpu.memory_space<vmem>>, vector<128x128xbf16>
    %c128_i32 = arith.constant 128 : i32
    %9 = arith.muli %arg1, %c128_i32 : i32
    %10 = tpu.assume_multiple %9, 128 : i32
    %c0_5 = arith.constant 0 : index
    %c0_6 = arith.constant 0 : index
    %11 = vector.load %arg14[%c0_5, %c0_6] : memref<128x32xf32, #tpu.memory_space<vmem>>, vector<128x32xf32>
    %12 = arith.index_cast %10 : i32 to index
    %c0_7 = arith.constant 0 : index
    %13 = vector.load %arg13[%12, %c0_7] : memref<256x32xbf16, #tpu.memory_space<vmem>>, vector<128x32xbf16>
    %cst = arith.constant dense<0.000000e+00> : vector<128x32xf32>
    %14 = tpu.matmul %8, %13, %cst {dimension_numbers = #tpu.dot_dimension_numbers<[1], [0], [0], [1], [0, 0, 1, 1], [], []>} : vector<128x128xbf16>, vector<128x32xbf16>, vector<128x32xf32> -> vector<128x32xf32>
    %15 = arith.addf %11, %14 : vector<128x32xf32>
    %c0_8 = arith.constant 0 : index
    %c0_9 = arith.constant 0 : index
    %16 = vector.load %arg14[%c0_8, %c0_9] : memref<128x32xf32, #tpu.memory_space<vmem>>, vector<128x32xf32>
    tpu.vector_store %arg14[%c0_8, %c0_9], %15 {strides = array<i32>} : memref<128x32xf32, #tpu.memory_space<vmem>>, vector<128x32xf32>,
    %c0_10 = arith.constant 0 : index
    %17 = arith.index_cast %10 : i32 to index
    %18 = vector.load %arg16[%c0_10, %17] : memref<8x256xf32, #tpu.memory_space<vmem>>, vector<8x128xf32>
    %c0_11 = arith.constant 0 : index
    %c0_12 = arith.constant 0 : index
    %19 = vector.load %arg3[%c0_11, %c0_12] : memref<8x128xbf16, #tpu.memory_space<vmem>>, vector<8x128xbf16>
    %cst_13 = arith.constant dense<0.000000e+00> : vector<8x128xf32>
    %20 = tpu.matmul %19, %8, %cst_13 {dimension_numbers = #tpu.dot_dimension_numbers<[1], [0], [0], [1], [0, 0, 1, 1], [], []>} : vector<8x128xbf16>, vector<128x128xbf16>, vector<8x128xf32> -> vector<8x128xf32>
    %21 = arith.addf %18, %20 : vector<8x128xf32>
    %c0_14 = arith.constant 0 : index
    %22 = arith.index_cast %10 : i32 to index
    %23 = vector.load %arg16[%c0_14, %22] : memref<8x256xf32, #tpu.memory_space<vmem>>, vector<8x128xf32>
    tpu.vector_store %arg16[%c0_14, %22], %21 {strides = array<i32>} : memref<8x256xf32, #tpu.memory_space<vmem>>, vector<8x128xf32>,
    %c1_i32 = arith.constant 1 : i32
    %24 = arith.cmpi eq, %arg1, %c1_i32 : i32
    %25 = arith.extui %24 : i1 to i32
    %c0_i32_15 = arith.constant 0 : i32
    %26 = arith.cmpi ne, %25, %c0_i32_15 : i32
    scf.if %26 {
      %c128_i32_19 = arith.constant 128 : i32
      %32 = arith.muli %arg0, %c128_i32_19 : i32
      %33 = tpu.assume_multiple %32, 128 : i32
      %c0_20 = arith.constant 0 : index
      %c0_21 = arith.constant 0 : index
      %34 = vector.load %arg14[%c0_20, %c0_21] : memref<128x32xf32, #tpu.memory_space<vmem>>, vector<128x32xf32>
      %c0_22 = arith.constant 0 : index
      %c0_23 = arith.constant 0 : index
      %35 = vector.load %arg6[%c0_22, %c0_23] : memref<1x32xf32, #tpu.memory_space<vmem>>, vector<1x32xf32>
      %36 = vector.broadcast %35 : vector<1x32xf32> to vector<128x32xf32>
      %37 = arith.addf %34, %36 : vector<128x32xf32>
      %cst_24 = arith.constant 0.000000e+00 : f32
      %38 = vector.broadcast %cst_24 : f32 to vector<128x32xf32>
      %39 = arith.maximumf %37, %38 : vector<128x32xf32>
      %c0_25 = arith.constant 0 : index
      %c0_26 = arith.constant 0 : index
      %40 = vector.load %arg7[%c0_25, %c0_26] : memref<32x32xf32, #tpu.memory_space<vmem>>, vector<32x32xf32>
      %cst_27 = arith.constant dense<0.000000e+00> : vector<128x32xf32>
      %41 = tpu.matmul %39, %40, %cst_27 {dimension_numbers = #tpu.dot_dimension_numbers<[1], [0], [0], [1], [0, 0, 1, 1], [], []>} : vector<128x32xf32>, vector<32x32xf32>, vector<128x32xf32> -> vector<128x32xf32>
      %42 = arith.index_cast %33 : i32 to index
      %c0_28 = arith.constant 0 : index
      %43 = vector.load %arg15[%42, %c0_28] : memref<256x32xf32, #tpu.memory_space<vmem>>, vector<128x32xf32>
      tpu.vector_store %arg15[%42, %c0_28], %41 {strides = array<i32>} : memref<256x32xf32, #tpu.memory_space<vmem>>, vector<128x32xf32>,
    } else {
    }
    %c1_i32_16 = arith.constant 1 : i32
    %27 = arith.cmpi eq, %arg0, %c1_i32_16 : i32
    %c1_i32_17 = arith.constant 1 : i32
    %28 = arith.cmpi eq, %arg1, %c1_i32_17 : i32
    %29 = arith.andi %27, %28 : i1
    %30 = arith.extui %29 : i1 to i32
    %c0_i32_18 = arith.constant 0 : i32
    %31 = arith.cmpi ne, %30, %c0_i32_18 : i32
    scf.if %31 {
      %c0_19 = arith.constant 0 : index
      %c0_20 = arith.constant 0 : index
      %32 = vector.load %arg16[%c0_19, %c0_20] : memref<8x256xf32, #tpu.memory_space<vmem>>, vector<8x256xf32>
      %c0_21 = arith.constant 0 : index
      %c0_22 = arith.constant 0 : index
      %33 = vector.load %arg15[%c0_21, %c0_22] : memref<256x32xf32, #tpu.memory_space<vmem>>, vector<256x32xf32>
      %cst_23 = arith.constant dense<0.000000e+00> : vector<8x32xf32>
      %34 = tpu.matmul %32, %33, %cst_23 {dimension_numbers = #tpu.dot_dimension_numbers<[1], [0], [0], [1], [0, 0, 1, 1], [], []>} : vector<8x256xf32>, vector<256x32xf32>, vector<8x32xf32> -> vector<8x32xf32>
      %c0_24 = arith.constant 0 : index
      %c0_25 = arith.constant 0 : index
      %35 = vector.load %arg11[%c0_24, %c0_25] : memref<8x1xf32, #tpu.memory_space<vmem>>, vector<8x1xf32>
      %36 = vector.broadcast %35 : vector<8x1xf32> to vector<8x32xf32>
      %37 = arith.mulf %34, %36 : vector<8x32xf32>
      %c0_26 = arith.constant 0 : index
      %c0_27 = arith.constant 0 : index
      %38 = vector.load %arg8[%c0_26, %c0_27] : memref<1x32xf32, #tpu.memory_space<vmem>>, vector<1x32xf32>
      %39 = vector.broadcast %38 : vector<1x32xf32> to vector<8x32xf32>
      %40 = arith.addf %37, %39 : vector<8x32xf32>
      %c0_28 = arith.constant 0 : index
      %c0_29 = arith.constant 0 : index
      %41 = vector.load %arg9[%c0_28, %c0_29] : memref<32x4xf32, #tpu.memory_space<vmem>>, vector<32x4xf32>
      %cst_30 = arith.constant dense<0.000000e+00> : vector<8x4xf32>
      %42 = tpu.matmul %40, %41, %cst_30 {dimension_numbers = #tpu.dot_dimension_numbers<[1], [0], [0], [1], [0, 0, 1, 1], [], []>} : vector<8x32xf32>, vector<32x4xf32>, vector<8x4xf32> -> vector<8x4xf32>
      %c0_31 = arith.constant 0 : index
      %c0_32 = arith.constant 0 : index
      %43 = vector.load %arg10[%c0_31, %c0_32] : memref<1x4xf32, #tpu.memory_space<vmem>>, vector<1x4xf32>
      %44 = vector.broadcast %43 : vector<1x4xf32> to vector<8x4xf32>
      %45 = arith.addf %42, %44 : vector<8x4xf32>
      %cst_33 = arith.constant dense<0xFF800000> : vector<8xf32>
      %46 = vector.multi_reduction <maximumf>, %45, %cst_33 [1] : vector<8x4xf32> to vector<8xf32>
      %47 = vector.shape_cast %46 : vector<8xf32> to vector<8x1xf32>
      %48 = vector.broadcast %47 : vector<8x1xf32> to vector<8x4xf32>
      %49 = arith.subf %45, %48 : vector<8x4xf32>
      %50 = math.exp %49 : vector<8x4xf32>
      %cst_34 = arith.constant dense<0.000000e+00> : vector<8xf32>
      %51 = vector.multi_reduction <add>, %50, %cst_34 [1] : vector<8x4xf32> to vector<8xf32>
      %52 = vector.shape_cast %51 : vector<8xf32> to vector<8x1xf32>
      %53 = math.log %52 : vector<8x1xf32>
      %54 = vector.broadcast %53 : vector<8x1xf32> to vector<8x4xf32>
      %55 = arith.subf %49, %54 : vector<8x4xf32>
      %c0_35 = arith.constant 0 : index
      %c0_36 = arith.constant 0 : index
      %56 = vector.load %arg12[%c0_35, %c0_36] : memref<8x4xf32, #tpu.memory_space<vmem>>, vector<8x4xf32>
      tpu.vector_store %arg12[%c0_35, %c0_36], %55 {strides = array<i32>} : memref<8x4xf32, #tpu.memory_space<vmem>>, vector<8x4xf32>,
    } else {
    }
    return
  }
  func.func @transform_0(%arg0: i32, %arg1: i32) -> (i32, i32) {
    %c0_i32 = arith.constant 0 : i32
    return %arg0, %arg1 : i32, i32
  }
  func.func @transform_1(%arg0: i32, %arg1: i32) -> (i32, i32) {
    %c0_i32 = arith.constant 0 : i32
    %c0_i32_0 = arith.constant 0 : i32
    return %c0_i32, %arg0 : i32, i32
  }
  func.func @transform_2(%arg0: i32, %arg1: i32) -> (i32, i32) {
    %c0_i32 = arith.constant 0 : i32
    %c0_i32_0 = arith.constant 0 : i32
    %c0_i32_1 = arith.constant 0 : i32
    return %c0_i32, %c0_i32_0 : i32, i32
  }
  func.func @transform_3(%arg0: i32, %arg1: i32) -> (i32, i32) {
    %c0_i32 = arith.constant 0 : i32
    %c0_i32_0 = arith.constant 0 : i32
    %c0_i32_1 = arith.constant 0 : i32
    return %c0_i32, %c0_i32_0 : i32, i32
  }
  func.func @transform_4(%arg0: i32, %arg1: i32) -> (i32, i32) {
    %c0_i32 = arith.constant 0 : i32
    %c0_i32_0 = arith.constant 0 : i32
    %c0_i32_1 = arith.constant 0 : i32
    return %c0_i32, %c0_i32_0 : i32, i32
  }
  func.func @transform_5(%arg0: i32, %arg1: i32) -> (i32, i32) {
    %c0_i32 = arith.constant 0 : i32
    %c0_i32_0 = arith.constant 0 : i32
    %c0_i32_1 = arith.constant 0 : i32
    return %c0_i32, %c0_i32_0 : i32, i32
  }
  func.func @transform_6(%arg0: i32, %arg1: i32) -> (i32, i32) {
    %c0_i32 = arith.constant 0 : i32
    %c0_i32_0 = arith.constant 0 : i32
    %c0_i32_1 = arith.constant 0 : i32
    return %c0_i32, %c0_i32_0 : i32, i32
  }
  func.func @transform_7(%arg0: i32, %arg1: i32) -> (i32, i32) {
    %c0_i32 = arith.constant 0 : i32
    %c0_i32_0 = arith.constant 0 : i32
    %c0_i32_1 = arith.constant 0 : i32
    return %c0_i32, %c0_i32_0 : i32, i32
  }
  func.func @transform_8(%arg0: i32, %arg1: i32) -> (i32, i32) {
    %c0_i32 = arith.constant 0 : i32
    %c0_i32_0 = arith.constant 0 : i32
    %c0_i32_1 = arith.constant 0 : i32
    return %c0_i32, %c0_i32_0 : i32, i32
  }
  func.func @transform_9(%arg0: i32, %arg1: i32) -> (i32, i32) {
    %c0_i32 = arith.constant 0 : i32
    %c0_i32_0 = arith.constant 0 : i32
    %c0_i32_1 = arith.constant 0 : i32
    return %c0_i32, %c0_i32_0 : i32, i32
  }
  func.func @transform_10(%arg0: i32, %arg1: i32) -> (i32, i32) {
    %c0_i32 = arith.constant 0 : i32
    %c0_i32_0 = arith.constant 0 : i32
    %c0_i32_1 = arith.constant 0 : i32
    return %c0_i32, %c0_i32_0 : i32, i32
  }
}

</mosaic_0001>

<bundles_post_ra>
// kernel: mul.1
= control target key start
LH: loop header
LB: loop body
LE: loop exit
PB: predicated region body
PF: predicated region fallthrough
CT: control target
= control target key end

     0   :  { %s34_s0 = inlined_call_operand.vmem [shape: f32[480], index: 0, kind: input, shape index: {}]   ;;  %s35_s1 = inlined_call_operand.vmem [shape: f32[480], index: 1, kind: input, shape index: {}]   ;;  %s36_s2 = inlined_call_operand.vmem [shape: f32[480], index: 2, kind: output, shape index: {}]  }
   0x1   :  { %v3_v0 = vld [vmem:[%s34_s0] sm:$0xf] }
   0x2   :  { %v4_v1 = vld [vmem:[%s35_s1] sm:$0xf] }
   0x3   :  { %v7_v2 = vmul.f32 %v4_v1, %v3_v0 }
   0x5   :  { %9 = vst [vmem:[%s36_s2] sm:$0xf] %v7_v2 }

// kernel: gating_gcn_forward.1
= control target key start
LH: loop header
LB: loop body
LE: loop exit
PB: predicated region body
PF: predicated region fallthrough
CT: control target
= control target key end

     0   :  { %s2325_s13 = smov 0   ;;  %s2327_s14 = smov 0   ;;  %s2723_s0 = inlined_call_operand.vmem [shape: bf16[256,256], index: 0, kind: input, shape index: {}]   ;;  %s2724_s1 = inlined_call_operand.vmem [shape: bf16[8,256], index: 1, kind: input, shape index: {}]   ;;  %s2725_s2 = inlined_call_operand.vmem [shape: f32[256,4], index: 2, kind: input, shape index: {}]   ;;  %s2726_s3 = inlined_call_operand.vmem [shape: f32[4,32], index: 3, kind: input, shape index: {}]   ;;  %s2727_s4 = inlined_call_operand.vmem [shape: f32[1,32], index: 4, kind: input, shape index: {}]   ;;  %s2728_s5 = inlined_call_operand.vmem [shape: f32[32,32], index: 5, kind: input, shape index: {}]   ;;  %s2729_s6 = inlined_call_operand.vmem [shape: f32[1,32], index: 6, kind: input, shape index: {}]   ;;  %s2730_s7 = inlined_call_operand.vmem [shape: f32[32,4], index: 7, kind: input, shape index: {}]   ;;  %s2731_s8 = inlined_call_operand.vmem [shape: f32[1,4], index: 8, kind: input, shape index: {}]   ;;  %s2732_s9 = inlined_call_operand.vmem [shape: f32[8,1], index: 9, kind: input, shape index: {}]   ;;  %s2733_s10 = inlined_call_operand.vmem [shape: f32[8,4], index: 10, kind: output, shape index: {}]  }
   0x1   :  { %s2329_s15 = smov 0   ;;  %s2331_s16 = smov 0  }
   0x2   :  { %s2333_s17 = smov 0   ;;  %s2335_s18 = smov 0  }
   0x3   :  { %s2337_s19 = smov 0  }
   0x4 LB: > { %s29_s20 = sadd.s32 1, %s2252_s17  ;;  %s32_s21 = sadd.s32 1, %s2256_s18  ;;  %s2260_s19 = sphi %s2337_s19, %s20_s19   ;;  %s2256_s18 = sphi %s2335_s18, %s2742_s18   ;;  %s2252_s17 = sphi %s2333_s17, %s2741_s17   ;;  %s2248_s16 = sphi %s2331_s16, %s2740_s16   ;;  %s2244_s15 = sphi %s2329_s15, %s2739_s15   ;;  %s2240_s14 = sphi %s2327_s14, %s2738_s14   ;;  %s2236_s13 = sphi %s2325_s13, %s2737_s13  }
   0x5   : > { %p30_p0 = scmp.ge.s32.totalorder %s29_s20, 2  ;;  %p48_p1 = scmp.ne.s32.totalorder %s2240_s14, %s2236_s13 }
   0x6   : > { %p49_p2 = scmp.eq.s32.totalorder %s2260_s19, 0  ;;  %s41_s25 = sadd.s32 1, %s2240_s14 }
   0x7   : > { %s2744_s20 = smov (%p30_p0, %s29_s20), 0  ;;  %s2746_s21 = smov (!%p30_p0, %s32_s21), %s2256_s18 }
   0x8   : > { %2735 = sst [smem:[#allocation7_spill]] %s2744_s20  ;;  %p50_p3 = por %p49_p2, %p48_p1 }
   0x9   : > { %p34_p4 = scmp.ge.s32.totalorder %s2746_s21, 2  ;;  %s37_s22 = ssub.s32 %s2252_s17, %s2744_s20 }
   0xa   : > { %p1736_p6 = scmp.ge.s32.totalorder %s2260_s19, 4 }
   0xb   : > { %s2748_s21 = smov (%p34_p4, %s2746_s21), 0 }
   0xc   : > { %s36_s23 = ssub.s32 %s2256_s18, %s2748_s21  ;;  %313 = sbr.rel (%p1736_p6) target bundleno = 35 (0x23), region = 48 }
   0xd   : > { %s38_s24 = sor.u32 %s37_s22, %s36_s23 }
   0xe   : > { %p39_p5 = scmp.eq.s32.totalorder %s38_s24, 0 }
  0x10   : > { %s2376_s26 = scalar_select %p39_p5, %s2240_s14, %s41_s25  }
  0x13   : > { %316 = sbr.rel (!%p50_p3) target bundleno = 35 (0x23), region = 52  ;;  %s318_s27 = sand.u32 (%p50_p3), 1, %s2240_s14  }
  0x14   : > { %s1813_s28 = sshll.u32 (%p50_p3), %s2256_s18, 5  ;;  %s1737_s29 = sshll.u32 (%p50_p3), %s318_s27, 6 }
  0x15   : > { %s323_s30 = sadd.s32 (%p50_p3), %s2252_s17, %s1813_s28  ;;  %s320_s23 = scalar_lea.vmem (%p50_p3), [#allocation6], %s1737_s29 }
  0x16   : > { %s1740_s11 = sshll.u32 (%p50_p3), %s323_s30, 2 }
  0x17   : > { %s2385_s22 = scalar_lea.vmem (%p50_p3), %s2723_s0, %s1740_s11 }
  0x18   : > { %v341_v0 = vld [vmem:[%s2385_s22] sm:$0xf] (%p50_p3)  ;;  %v343_v1 = vld [vmem:[%s2385_s22 + $0x8] sm:$0xf] (%p50_p3)  ;;  %v345_v2 = vld [vmem:[%s2385_s22 + $0x10] sm:$0xf] (%p50_p3) }
  0x19   : > { %342 = vst [vmem:[%s320_s23] sm:$0xf] (%p50_p3), %v341_v0  ;;  %344 = vst [vmem:[%s320_s23 + $0x4] sm:$0xf] (%p50_p3), %v343_v1  ;;  %v347_v3 = vld [vmem:[%s2385_s22 + $0x18] sm:$0xf] (%p50_p3) }
  0x1a   : > { %346 = vst [vmem:[%s320_s23 + $0x8] sm:$0xf] %v345_v2  ;;  %v349_v4 = vld [vmem:[%s2385_s22 + $0x20] sm:$0xf]  ;;  %v351_v5 = vld [vmem:[%s2385_s22 + $0x28] sm:$0xf] }
  0x1b   : > { %348 = vst [vmem:[%s320_s23 + $0xc] sm:$0xf] %v347_v3  ;;  %350 = vst [vmem:[%s320_s23 + $0x10] sm:$0xf] %v349_v4  ;;  %v353_v6 = vld [vmem:[%s2385_s22 + $0x30] sm:$0xf] }
  0x1c   : > { %352 = vst [vmem:[%s320_s23 + $0x14] sm:$0xf] %v351_v5  ;;  %v355_v7 = vld [vmem:[%s2385_s22 + $0x38] sm:$0xf]  ;;  %v357_v8 = vld [vmem:[%s2385_s22 + $0x40] sm:$0xf] }
  0x1d   : > { %354 = vst [vmem:[%s320_s23 + $0x18] sm:$0xf] %v353_v6  ;;  %356 = vst [vmem:[%s320_s23 + $0x1c] sm:$0xf] %v355_v7  ;;  %v359_v9 = vld [vmem:[%s2385_s22 + $0x48] sm:$0xf] }
  0x1e   : > { %358 = vst [vmem:[%s320_s23 + $0x20] sm:$0xf] %v357_v8  ;;  %v361_v10 = vld [vmem:[%s2385_s22 + $0x50] sm:$0xf]  ;;  %v363_v11 = vld [vmem:[%s2385_s22 + $0x58] sm:$0xf] }
  0x1f   : > { %360 = vst [vmem:[%s320_s23 + $0x24] sm:$0xf] %v359_v9  ;;  %362 = vst [vmem:[%s320_s23 + $0x28] sm:$0xf] %v361_v10  ;;  %v365_v12 = vld [vmem:[%s2385_s22 + $0x60] sm:$0xf] }
  0x20   : > { %364 = vst [vmem:[%s320_s23 + $0x2c] sm:$0xf] %v363_v11  ;;  %v367_v13 = vld [vmem:[%s2385_s22 + $0x68] sm:$0xf]  ;;  %v369_v14 = vld [vmem:[%s2385_s22 + $0x70] sm:$0xf] }
  0x21   : > { %366 = vst [vmem:[%s320_s23 + $0x30] sm:$0xf] %v365_v12  ;;  %368 = vst [vmem:[%s320_s23 + $0x34] sm:$0xf] %v367_v13  ;;  %v371_v15 = vld [vmem:[%s2385_s22 + $0x78] sm:$0xf] }
  0x22   : > { %370 = vst [vmem:[%s320_s23 + $0x38] sm:$0xf] %v369_v14  ;;  %372 = vst [vmem:[%s320_s23 + $0x3c] sm:$0xf] %v371_v15 }
  0x23 PF: > { %p1741_p7 = scmp.ge.s32.totalorder %s2260_s19, 1  ;;  %p433_p8 = scmp.lt.s32.totalorder %s2260_s19, 5 }
  0x25   : > { %p434_p9 = pnand %p1741_p7, %p433_p8 }
  0x26   : > { %s440_s20 = sand.u32 (!%p434_p9), 1, %s2236_s13   ;;  %p477_p10 = scmp.lt.s32.totalorder (!%p434_p9), %s2248_s16, 1 }
  0x27   : > { %437 = sbr.rel (%p434_p9) target bundleno = 1604 (0x644), region = 97  ;;  %s1742_s24 = sshll.u32 (!%p434_p9), %s440_s20, 6 }
  0x28   : > { %p482_p11 = scmp.eq.s32.totalorder (!%p434_p9), %s2248_s16, 0  ;;  %p483_p12 = scmp.eq.s32.totalorder (!%p434_p9), %s2244_s15, 0 }
  0x29   : > { %s2415_s11 = scalar_lea.vmem (!%p434_p9), [#allocation6], %s1742_s24 }
  0x2a   : > { %p484_p13 = pnand (!%p434_p9), %p483_p12, %p482_p11 }
  0x2e   : > { %s478_s25 = scalar_select %p477_p10, %s2248_s16, 1 }
  0x2f   : > { %487 = sbr.rel (%p484_p13) target bundleno = 295 (0x127), region = 105  ;;  %v522_v16 = vld [vmem:[%s2726_s3] sm:$0xf] (!%p484_p13)  ;;  %vm620_vm0 = vcmask (!%p484_p13), 1043456   ;;  %vm523_vm1 = vcmask (!%p484_p13), 31744   ;;  %v2262_v18 = vmov (!%p484_p13), 0.0  }
  0x30   : > { %s1743_s27 = sshll.u32 %s478_s25, 2  ;;  %v490_v17 = vld [vmem:[%s2725_s2] sm:$0xff] (!%p484_p13)  ;;  %488 = vst [vmem:[#allocation5] sm:$0xff] (!%p484_p13), %v2262_v18  ;;  %489 = vst [vmem:[#allocation5 + $0x8] sm:$0xff] (!%p484_p13), %v2262_v18  ;;  %1932 = vmatprep.subr.msk.mxu0 (!%p484_p13), %vm620_vm0, %v522_v16  ;;  %2123 = vmatprep.subr.msk.mxu1 (!%p484_p13), %vm620_vm0, %v522_v16  ;;  %v491_v20 = vld [vmem:[%s2725_s2 + $0x8] sm:$0xff] (!%p484_p13)  ;;  %vm865_vm2 = vcmask (!%p484_p13), 261120  }
  0x31   : > { %s2413_s30 = scalar_lea.vmem %s2724_s1, %s1743_s27  ;;  %v506_v19 = vld [vmem:[%s2725_s2 + $0x80] sm:$0xff] (!%p484_p13)  ;;  %v507_v21 = vld [vmem:[%s2725_s2 + $0x88] sm:$0xff] (!%p484_p13)  ;;  %1933 = vmatpush3.msk.msra.mxu0 (!%p484_p13), %vm620_vm0, %v522_v16  ;;  %2124 = vmatpush3.msk.msra.mxu1 (!%p484_p13), %vm620_vm0, %v522_v16  ;;  %v492_v22 = vld [vmem:[%s2725_s2 + $0x10] sm:$0xff] (!%p484_p13) }
  0x32   : > { %v508_v23 = vld [vmem:[%s2725_s2 + $0x90] sm:$0xff] (!%p484_p13)  ;;  %1934 = vmatprep.mubr.msk.f32.mxu0 (!%p484_p13), %vm523_vm1, %v490_v17  ;;  %1958 = vmatprep.mubr.msk.f32.mxu1 (!%p484_p13), %vm523_vm1, %v506_v19  ;;  %v493_v24 = vld [vmem:[%s2725_s2 + $0x18] sm:$0xff] (!%p484_p13)  ;;  %v494_v26 = vld [vmem:[%s2725_s2 + $0x20] sm:$0xff] (!%p484_p13) }
  0x33   : > { %1935 = vmatmul.mubr.msk.f32.vlgmr.msra.gmra.mrb[0].mxu0 (!%p484_p13), %vm523_vm1, %v491_v20  ;;  %1959 = vmatmul.mubr.msk.f32.vlgmr.msra.gmra.mrb[0].mxu1 (!%p484_p13), %vm523_vm1, %v507_v21  ;;  %v509_v25 = vld [vmem:[%s2725_s2 + $0x98] sm:$0xff] (!%p484_p13)  ;;  %v510_v27 = vld [vmem:[%s2725_s2 + $0xa0] sm:$0xff] (!%p484_p13)  ;;  %v495_v28 = vld [vmem:[%s2725_s2 + $0x28] sm:$0xff] (!%p484_p13) }
  0x34   : > { %1937 = vmatprep.mubr.msk.f32.mxu0 (!%p484_p13), %vm523_vm1, %v492_v22  ;;  %1961 = vmatprep.mubr.msk.f32.mxu1 (!%p484_p13), %vm523_vm1, %v508_v23  ;;  %v511_v29 = vld [vmem:[%s2725_s2 + $0xa8] sm:$0xff] (!%p484_p13)  ;;  %v496_v30 = vld [vmem:[%s2725_s2 + $0x30] sm:$0xff] (!%p484_p13)  ;;  %v497_v32 = vld [vmem:[%s2725_s2 + $0x38] sm:$0xff] (!%p484_p13) }
  0x35   : > { %v512_v31 = vld [vmem:[%s2725_s2 + $0xb0] sm:$0xff] (!%p484_p13)  ;;  %v513_v33 = vld [vmem:[%s2725_s2 + $0xb8] sm:$0xff] (!%p484_p13)  ;;  %v498_v34 = vld [vmem:[%s2725_s2 + $0x40] sm:$0xff] (!%p484_p13) }
  0x36   : > { %v514_v35 = vld [vmem:[%s2725_s2 + $0xc0] sm:$0xff]  ;;  %v499_v36 = vld [vmem:[%s2725_s2 + $0x48] sm:$0xff]  ;;  %v500_v38 = vld [vmem:[%s2725_s2 + $0x50] sm:$0xff] }
  0x37   : > { %1938 = vmatmul.mubr.msk.f32.gmra.mrb[2].mxu0 %vm523_vm1, %v493_v24  ;;  %1962 = vmatmul.mubr.msk.f32.gmra.mrb[2].mxu1 %vm523_vm1, %v509_v25  ;;  %v515_v37 = vld [vmem:[%s2725_s2 + $0xc8] sm:$0xff]  ;;  %v516_v39 = vld [vmem:[%s2725_s2 + $0xd0] sm:$0xff]  ;;  %v501_v40 = vld [vmem:[%s2725_s2 + $0x58] sm:$0xff] }
  0x38   : > { %1940 = vmatprep.mubr.msk.f32.mxu0 %vm523_vm1, %v494_v26  ;;  %1964 = vmatprep.mubr.msk.f32.mxu1 %vm523_vm1, %v510_v27  ;;  %v517_v41 = vld [vmem:[%s2725_s2 + $0xd8] sm:$0xff]  ;;  %v502_v42 = vld [vmem:[%s2725_s2 + $0x60] sm:$0xff]  ;;  %v503_v44 = vld [vmem:[%s2725_s2 + $0x68] sm:$0xff] }
  0x39   : > { %v518_v43 = vld [vmem:[%s2725_s2 + $0xe0] sm:$0xff]  ;;  %v519_v45 = vld [vmem:[%s2725_s2 + $0xe8] sm:$0xff]  ;;  %v504_v46 = vld [vmem:[%s2725_s2 + $0x70] sm:$0xff] }
  0x3a   : > { %v520_v47 = vld [vmem:[%s2725_s2 + $0xf0] sm:$0xff]  ;;  %v505_v48 = vld [vmem:[%s2725_s2 + $0x78] sm:$0xff] }
  0x3b   : > { %1941 = vmatmul.mubr.msk.f32.gmra.mrb[4].mxu0 %vm523_vm1, %v495_v28  ;;  %1965 = vmatmul.mubr.msk.f32.gmra.mrb[4].mxu1 %vm523_vm1, %v511_v29  ;;  %v521_v49 = vld [vmem:[%s2725_s2 + $0xf8] sm:$0xff] }
  0x3c   : > { %1943 = vmatprep.mubr.msk.f32.mxu0 %vm523_vm1, %v496_v30  ;;  %1967 = vmatprep.mubr.msk.f32.mxu1 %vm523_vm1, %v512_v31 }
  0x3f   : > { %1944 = vmatmul.mubr.msk.f32.gmra.mrb[6].mxu0 %vm523_vm1, %v497_v32  ;;  %1968 = vmatmul.mubr.msk.f32.gmra.mrb[6].mxu1 %vm523_vm1, %v513_v33 }
  0x40   : > { %1946 = vmatprep.mubr.msk.f32.mxu0 %vm523_vm1, %v498_v34  ;;  %1970 = vmatprep.mubr.msk.f32.mxu1 %vm523_vm1, %v514_v35 }
  0x43   : > { %1947 = vmatmul.mubr.msk.f32.gmra.mrb[8].mxu0 %vm523_vm1, %v499_v36  ;;  %1971 = vmatmul.mubr.msk.f32.gmra.mrb[8].mxu1 %vm523_vm1, %v515_v37 }
  0x44   : > { %1949 = vmatprep.mubr.msk.f32.mxu0 %vm523_vm1, %v500_v38  ;;  %1973 = vmatprep.mubr.msk.f32.mxu1 %vm523_vm1, %v516_v39 }
  0x47   : > { %1950 = vmatmul.mubr.msk.f32.gmra.mrb[10].mxu0 %vm523_vm1, %v501_v40  ;;  %1974 = vmatmul.mubr.msk.f32.gmra.mrb[10].mxu1 %vm523_vm1, %v517_v41 }
  0x48   : > { %1952 = vmatprep.mubr.msk.f32.mxu0 %vm523_vm1, %v502_v42  ;;  %1976 = vmatprep.mubr.msk.f32.mxu1 %vm523_vm1, %v518_v43 }
  0x4b   : > { %1953 = vmatmul.mubr.msk.f32.gmra.mrb[12].mxu0 %vm523_vm1, %v503_v44  ;;  %1977 = vmatmul.mubr.msk.f32.gmra.mrb[12].mxu1 %vm523_vm1, %v519_v45 }
  0x4c   : > { %1955 = vmatprep.mubr.msk.f32.mxu0 %vm523_vm1, %v504_v46  ;;  %1979 = vmatprep.mubr.msk.f32.mxu1 %vm523_vm1, %v520_v47 }
  0x4f   : > { %1956 = vmatmul.mubr.msk.f32.gmra.mrb[14].mxu0 %vm523_vm1, %v505_v48  ;;  %1980 = vmatmul.mubr.msk.f32.gmra.mrb[14].mxu1 %vm523_vm1, %v521_v49 }
 0x106   : > { %v1936_v50 = vpop.f32.mrb[0].mxu0  ;;  %v1960_v51 = vpop.f32.mrb[0].mxu1 }
 0x107   : > { %v690_v52 = vpop.f32.mrb[1].mxu0  ;;  %v770_v53 = vpop.f32.mrb[1].mxu1 }
 0x108   : > { %v849_v54 = vpack.c.bf16 %v1936_v50, %v690_v52  ;;  %v857_v55 = vpack.c.bf16 %v1960_v51, %v770_v53 }
 0x10a   : > { %866 = vst.msk [vmem:[#allocation2] sm:$0xff] %vm865_vm2, %v849_v54  ;;  %874 = vst.msk [vmem:[#allocation2 + $0x40] sm:$0xff] %vm865_vm2, %v857_v55  ;;  %v1939_v56 = vpop.f32.mrb[2].mxu0  ;;  %v1963_v57 = vpop.f32.mrb[2].mxu1 }
 0x10b   : > { %v700_v58 = vpop.f32.mrb[3].mxu0  ;;  %v780_v59 = vpop.f32.mrb[3].mxu1 }
 0x10c   : > { %v850_v60 = vpack.c.bf16 %v1939_v56, %v700_v58  ;;  %v858_v61 = vpack.c.bf16 %v1963_v57, %v780_v59 }
 0x10e   : > { %867 = vst.msk [vmem:[#allocation2 + $0x8] sm:$0xff] %vm865_vm2, %v850_v60  ;;  %875 = vst.msk [vmem:[#allocation2 + $0x48] sm:$0xff] %vm865_vm2, %v858_v61  ;;  %v1942_v62 = vpop.f32.mrb[4].mxu0  ;;  %v1966_v63 = vpop.f32.mrb[4].mxu1 }
 0x10f   : > { %v710_v0 = vpop.f32.mrb[5].mxu0  ;;  %v790_v1 = vpop.f32.mrb[5].mxu1 }
 0x110   : > { %v851_v2 = vpack.c.bf16 %v1942_v62, %v710_v0  ;;  %v859_v3 = vpack.c.bf16 %v1966_v63, %v790_v1 }
 0x112   : > { %868 = vst.msk [vmem:[#allocation2 + $0x10] sm:$0xff] %vm865_vm2, %v851_v2  ;;  %876 = vst.msk [vmem:[#allocation2 + $0x50] sm:$0xff] %vm865_vm2, %v859_v3  ;;  %v1945_v4 = vpop.f32.mrb[6].mxu0  ;;  %v1969_v5 = vpop.f32.mrb[6].mxu1 }
 0x113   : > { %v720_v6 = vpop.f32.mrb[7].mxu0  ;;  %v800_v7 = vpop.f32.mrb[7].mxu1 }
 0x114   : > { %v852_v8 = vpack.c.bf16 %v1945_v4, %v720_v6  ;;  %v860_v9 = vpack.c.bf16 %v1969_v5, %v800_v7 }
 0x116   : > { %869 = vst.msk [vmem:[#allocation2 + $0x18] sm:$0xff] %vm865_vm2, %v852_v8  ;;  %877 = vst.msk [vmem:[#allocation2 + $0x58] sm:$0xff] %vm865_vm2, %v860_v9  ;;  %v1948_v10 = vpop.f32.mrb[8].mxu0  ;;  %v1972_v11 = vpop.f32.mrb[8].mxu1 }
 0x117   : > { %v730_v12 = vpop.f32.mrb[9].mxu0  ;;  %v810_v13 = vpop.f32.mrb[9].mxu1 }
 0x118   : > { %v853_v14 = vpack.c.bf16 %v1948_v10, %v730_v12  ;;  %v861_v15 = vpack.c.bf16 %v1972_v11, %v810_v13 }
 0x11a   : > { %870 = vst.msk [vmem:[#allocation2 + $0x20] sm:$0xff] %vm865_vm2, %v853_v14  ;;  %878 = vst.msk [vmem:[#allocation2 + $0x60] sm:$0xff] %vm865_vm2, %v861_v15  ;;  %v1951_v16 = vpop.f32.mrb[10].mxu0  ;;  %v1975_v17 = vpop.f32.mrb[10].mxu1 }
 0x11b   : > { %v740_v18 = vpop.f32.mrb[11].mxu0  ;;  %v820_v19 = vpop.f32.mrb[11].mxu1 }
 0x11c   : > { %v854_v20 = vpack.c.bf16 %v1951_v16, %v740_v18  ;;  %v862_v21 = vpack.c.bf16 %v1975_v17, %v820_v19 }
 0x11e   : > { %871 = vst.msk [vmem:[#allocation2 + $0x28] sm:$0xff] %vm865_vm2, %v854_v20  ;;  %879 = vst.msk [vmem:[#allocation2 + $0x68] sm:$0xff] %vm865_vm2, %v862_v21  ;;  %v1954_v22 = vpop.f32.mrb[12].mxu0  ;;  %v1978_v23 = vpop.f32.mrb[12].mxu1 }
 0x11f   : > { %v750_v24 = vpop.f32.mrb[13].mxu0  ;;  %v830_v25 = vpop.f32.mrb[13].mxu1 }
 0x120   : > { %v855_v26 = vpack.c.bf16 %v1954_v22, %v750_v24  ;;  %v863_v27 = vpack.c.bf16 %v1978_v23, %v830_v25 }
 0x122   : > { %872 = vst.msk [vmem:[#allocation2 + $0x30] sm:$0xff] %vm865_vm2, %v855_v26  ;;  %880 = vst.msk [vmem:[#allocation2 + $0x70] sm:$0xff] %vm865_vm2, %v863_v27  ;;  %v1957_v28 = vpop.f32.mrb[14].mxu0  ;;  %v1981_v29 = vpop.f32.mrb[14].mxu1 }
 0x123   : > { %v760_v30 = vpop.f32.mrb[15].mxu0  ;;  %v840_v31 = vpop.f32.mrb[15].mxu1 }
 0x124   : > { %v856_v32 = vpack.c.bf16 %v1957_v28, %v760_v30  ;;  %v864_v33 = vpack.c.bf16 %v1981_v29, %v840_v31 }
 0x126   : > { %873 = vst.msk [vmem:[#allocation2 + $0x38] sm:$0xff] %vm865_vm2, %v856_v32  ;;  %881 = vst.msk [vmem:[#allocation2 + $0x78] sm:$0xff] %vm865_vm2, %v864_v33 }
 0x127 PF: > { %p1777_p0 = scmp.ne.s32.totalorder %s2244_s15, 0 }
 0x128   : > { %vm885_vm3 = vcmask (!%p1777_p0), 261120   ;;  %v2263_v34 = vmov (!%p1777_p0), 0.0  }
 0x129   : > { %884 = sbr.rel (%p1777_p0) target bundleno = 305 (0x131), region = 109  ;;  %886 = vst.msk [vmem:[#allocation3] sm:$0xff] (!%p1777_p0), %vm885_vm3, %v2263_v34  ;;  %887 = vst.msk [vmem:[#allocation3 + $0x8] sm:$0xff] (!%p1777_p0), %vm885_vm3, %v2263_v34 }
 0x12a   : > { %888 = vst.msk [vmem:[#allocation3 + $0x10] sm:$0xff] (!%p1777_p0), %vm885_vm3, %v2263_v34  ;;  %889 = vst.msk [vmem:[#allocation3 + $0x18] sm:$0xff] (!%p1777_p0), %vm885_vm3, %v2263_v34 }
 0x12b   : > { %890 = vst.msk [vmem:[#allocation3 + $0x20] sm:$0xff] (!%p1777_p0), %vm885_vm3, %v2263_v34  ;;  %891 = vst.msk [vmem:[#allocation3 + $0x28] sm:$0xff] (!%p1777_p0), %vm885_vm3, %v2263_v34 }
 0x12c   : > { %892 = vst.msk [vmem:[#allocation3 + $0x30] sm:$0xff] (!%p1777_p0), %vm885_vm3, %v2263_v34  ;;  %893 = vst.msk [vmem:[#allocation3 + $0x38] sm:$0xff] (!%p1777_p0), %vm885_vm3, %v2263_v34 }
 0x12d   : > { %894 = vst.msk [vmem:[#allocation3 + $0x40] sm:$0xff] (!%p1777_p0), %vm885_vm3, %v2263_v34  ;;  %895 = vst.msk [vmem:[#allocation3 + $0x48] sm:$0xff] (!%p1777_p0), %vm885_vm3, %v2263_v34 }
 0x12e   : > { %896 = vst.msk [vmem:[#allocation3 + $0x50] sm:$0xff] (!%p1777_p0), %vm885_vm3, %v2263_v34  ;;  %897 = vst.msk [vmem:[#allocation3 + $0x58] sm:$0xff] (!%p1777_p0), %vm885_vm3, %v2263_v34 }
 0x12f   : > { %898 = vst.msk [vmem:[#allocation3 + $0x60] sm:$0xff] (!%p1777_p0), %vm885_vm3, %v2263_v34  ;;  %899 = vst.msk [vmem:[#allocation3 + $0x68] sm:$0xff] (!%p1777_p0), %vm885_vm3, %v2263_v34 }
 0x130   : > { %900 = vst.msk [vmem:[#allocation3 + $0x70] sm:$0xff] %vm885_vm3, %v2263_v34  ;;  %901 = vst.msk [vmem:[#allocation3 + $0x78] sm:$0xff] %vm885_vm3, %v2263_v34 }
 0x131 PF: > { %s1778_s24 = sshll.u32 %s2244_s15, 7  ;;  %v2264_v35 = vmov 0.0   ;;  %v2193_v36 = vld [vmem:[%s2415_s11] sm:$0xff]   ;;  %v2194_v37 = vld [vmem:[%s2415_s11 + $0x8] sm:$0xff]   ;;  %vm2265_vm4 = vmmov 0   ;;  %v2195_v40 = vld [vmem:[%s2415_s11 + $0x10] sm:$0xff]  }
 0x132   : > { %s935_s27 = sshra.s32 %s1778_s24, 4  ;;  %2014 = vmatprep.subr.bf16.mxu1 %v2264_v35  ;;  %1998 = vmatprep.mubr.bf16.mxu0 %v2193_v36  ;;  %v2196_v42 = vld [vmem:[%s2415_s11 + $0x18] sm:$0xff]   ;;  %v2197_v44 = vld [vmem:[%s2415_s11 + $0x20] sm:$0xff]   ;;  %v2198_v46 = vld [vmem:[%s2415_s11 + $0x28] sm:$0xff]   ;;  %p1173_p1 = scmp.eq.s32.totalorder %s2244_s15, 1  ;;  %vm1108_vm5 = vcmask 261120  }
 0x133   : > { %s1779_s28 = sshll.u32 %s935_s27, 3  ;;  %2015 = vmatpush3.bf16.msra.mxu1 %v2193_v36  ;;  %2030 = vmatprep.mubr.msk.bf16.mxu1 %vm2265_vm4, %v2264_v35  ;;  %v2199_v48 = vld [vmem:[%s2415_s11 + $0x30] sm:$0xff]   ;;  %v2200_v50 = vld [vmem:[%s2415_s11 + $0x38] sm:$0xff]   ;;  %s1125_s11 = sshra.s32 %s1778_s24, 7  ;;  %v921_v55 = vld [vmem:[#allocation3 + $0x10] sm:$0xff] }
 0x134   : > { %s2586_s29 = scalar_lea.vmem [#allocation2], %s1779_s28  ;;  %2016 = vmatprep.subr.bf16.mxu1 %v2264_v35  ;;  %v1130_v52 = vld [vmem:[%s2413_s30] sm:$0xf]  ;;  %s1788_s12 = sshll.u32 %s1125_s11, 3  ;;  %v922_v61 = vld [vmem:[#allocation3 + $0x18] sm:$0xff]  ;;  %v920_v1 = vld [vmem:[#allocation3 + $0x8] sm:$0xff] }
 0x135   : > { %v939_v38 = vld [vmem:[%s2586_s29] sm:$0xff]  ;;  %v940_v39 = vld [vmem:[%s2586_s29 + $0x8] sm:$0xff]  ;;  %v941_v41 = vld [vmem:[%s2586_s29 + $0x10] sm:$0xff]  ;;  %s1128_s22 = scalar_lea.vmem [#allocation5], %s1788_s12  ;;  %p1789_p2 = scmp.ne.s32.totalorder %s2244_s15, 1 }
 0x136   : > { %1982 = vmatprep.subr.bf16.mxu0 %v939_v38  ;;  %v942_v43 = vld [vmem:[%s2586_s29 + $0x18] sm:$0xff]  ;;  %v943_v45 = vld [vmem:[%s2586_s29 + $0x20] sm:$0xff]  ;;  %v944_v47 = vld [vmem:[%s2586_s29 + $0x28] sm:$0xff]  ;;  %s1790_s12 = sshll.u32 (!%p1789_p2), %s2248_s16, 7 }
 0x137   : > { %1983 = vmatpush3.bf16.msra.mxu0 %v939_v38  ;;  %2017 = vmatpush3.bf16.msra.mxu1 %v2194_v37  ;;  %v945_v49 = vld [vmem:[%s2586_s29 + $0x30] sm:$0xff]  ;;  %v946_v51 = vld [vmem:[%s2586_s29 + $0x38] sm:$0xff]  ;;  %v1129_v53 = vld [vmem:[%s1128_s22] sm:$0xff] }
 0x138   : > { %1984 = vmatprep.subr.bf16.mxu0 %v940_v39  ;;  %2018 = vmatprep.subr.bf16.mxu1 %v2264_v35  ;;  %v919_v58 = vld [vmem:[#allocation3] sm:$0xff]  ;;  %v925_v7 = vld [vmem:[#allocation3 + $0x30] sm:$0xff]  ;;  %v926_v10 = vld [vmem:[#allocation3 + $0x38] sm:$0xff] }
 0x139   : > { %v923_v8 = vld [vmem:[#allocation3 + $0x20] sm:$0xff]  ;;  %v924_v13 = vld [vmem:[#allocation3 + $0x28] sm:$0xff]  ;;  %v929_v19 = vld [vmem:[#allocation3 + $0x50] sm:$0xff] }
 0x13a   : > { %v927_v20 = vld [vmem:[#allocation3 + $0x40] sm:$0xff]  ;;  %v930_v22 = vld [vmem:[#allocation3 + $0x58] sm:$0xff]  ;;  %v928_v25 = vld [vmem:[#allocation3 + $0x48] sm:$0xff] }
 0x13b   : > { %1985 = vmatpush3.bf16.msra.mxu0 %v940_v39  ;;  %2019 = vmatpush3.bf16.msra.mxu1 %v2195_v40  ;;  %v933_v31 = vld [vmem:[#allocation3 + $0x70] sm:$0xff]  ;;  %v931_v32 = vld [vmem:[#allocation3 + $0x60] sm:$0xff]  ;;  %v934_v34 = vld [vmem:[#allocation3 + $0x78] sm:$0xff] }
 0x13c   : > { %1986 = vmatprep.subr.bf16.mxu0 %v941_v41  ;;  %2020 = vmatprep.subr.bf16.mxu1 %v2264_v35 }
 0x13f   : > { %1987 = vmatpush3.bf16.msra.mxu0 %v941_v41  ;;  %2021 = vmatpush3.bf16.msra.mxu1 %v2196_v42 }
 0x140   : > { %1988 = vmatprep.subr.bf16.mxu0 %v942_v43  ;;  %2022 = vmatprep.subr.bf16.mxu1 %v2264_v35 }
 0x143   : > { %1989 = vmatpush3.bf16.msra.mxu0 %v942_v43  ;;  %2023 = vmatpush3.bf16.msra.mxu1 %v2197_v44  ;;  %v1233_v43 = vld [vmem:[%s2728_s5] sm:$0xff] (!%p1789_p2) }
 0x144   : > { %1990 = vmatprep.subr.bf16.mxu0 %v943_v45  ;;  %2024 = vmatprep.subr.bf16.mxu1 %v2264_v35 }
 0x147   : > { %1991 = vmatpush3.bf16.msra.mxu0 %v943_v45  ;;  %2025 = vmatpush3.bf16.msra.mxu1 %v2198_v46  ;;  %v1235_v45 = vld [vmem:[%s2728_s5 + $0x10] sm:$0xff] (!%p1789_p2) }
 0x148   : > { %1992 = vmatprep.subr.bf16.mxu0 %v944_v47  ;;  %2026 = vmatprep.subr.bf16.mxu1 %v2264_v35 }
 0x14b   : > { %1993 = vmatpush3.bf16.msra.mxu0 %v944_v47  ;;  %2027 = vmatpush3.bf16.msra.mxu1 %v2199_v48  ;;  %v1236_v47 = vld [vmem:[%s2728_s5 + $0x18] sm:$0xff] (!%p1789_p2) }
 0x14c   : > { %1994 = vmatprep.subr.bf16.mxu0 %v945_v49  ;;  %2028 = vmatprep.subr.bf16.mxu1 %v2264_v35 }
 0x14f   : > { %1995 = vmatpush3.bf16.msra.mxu0 %v945_v49  ;;  %2029 = vmatpush3.bf16.msra.mxu1 %v2200_v50  ;;  %v1791_v49 = vld [vmem:[%s2727_s4] ss:$0 sm:$0xff] (!%p1789_p2) }
 0x150   : > { %1996 = vmatprep.subr.bf16.mxu0 %v946_v51 }
 0x152   : > { %2031 = vmatmul.mubr.bf16.vlgmr.msra.gmra.mrb[0].mxu1 %v1130_v52 }
 0x153   : > { %1997 = vmatpush3.bf16.msra.mxu0 %v946_v51 }
 0x156   : > { %1999 = vmatmul.mubr.bf16.vlgmr.msra.gmra.mrb[0].mxu0 %v2194_v37  ;;  %v932_v37 = vld [vmem:[#allocation3 + $0x68] sm:$0xff] }
 0x157   : > { %2002 = vmatprep.mubr.bf16.mxu0 %v2195_v40 }
 0x15e   : > { %2003 = vmatmul.mubr.bf16.gmra.mrb[4].mxu0 %v2196_v42 }
 0x15f   : > { %2006 = vmatprep.mubr.bf16.mxu0 %v2197_v44  ;;  %v1234_v44 = vld [vmem:[%s2728_s5 + $0x8] sm:$0xff] (!%p1789_p2) }
 0x166   : > { %2007 = vmatmul.mubr.bf16.gmra.mrb[8].mxu0 %v2198_v46  ;;  %v2077_v46 = vpack.c.bf16 (!%p1789_p2), %v1234_v44, %v1233_v43 }
 0x167   : > { %2010 = vmatprep.mubr.bf16.mxu0 %v2199_v48 }
 0x168   : > { %2078 = vmatprep.subr.bf16.mxu0 (!%p1789_p2), %v2077_v46  ;;  %2125 = vmatprep.subr.bf16.mxu1 (!%p1789_p2), %v2077_v46 }
 0x169   : > { %2080 = vmatpush3.bf16.msra.mxu0 (!%p1789_p2), %v2077_v46  ;;  %2127 = vmatpush3.bf16.msra.mxu1 (!%p1789_p2), %v2077_v46 }
 0x16e   : > { %2011 = vmatmul.mubr.bf16.gmra.mrb[12].mxu0 %v2200_v50  ;;  %v2081_v50 = vpack.c.bf16 (!%p1789_p2), %v1236_v47, %v1235_v45 }
 0x170   : > { %2082 = vmatprep.subr.bf16.mxu0 (!%p1789_p2), %v2081_v50  ;;  %2126 = vmatprep.subr.bf16.mxu1 (!%p1789_p2), %v2081_v50 }
 0x171   : > { %2084 = vmatpush3.bf16.msra.mxu0 (!%p1789_p2), %v2081_v50  ;;  %2128 = vmatpush3.bf16.msra.mxu1 (!%p1789_p2), %v2081_v50 }
 0x225   : > { %v1165_v54 = vpop.f32.mrb[0].mxu1 }
 0x226   : > { %v1171_v56 = vadd.f32 %v1165_v54, %v1129_v53  ;;  %v2032_v57 = vpop.f32.mrb[1].mxu1 }
 0x227   : > { %v1168_v59 = vpop.f32.mrb[2].mxu1 }
 0x228   : > { %1172 = vst [vmem:[%s1128_s22] sm:$0xff] %v1171_v56  ;;  %v2033_v62 = vpop.f32.mrb[3].mxu1  ;;  %s1430_s22 = scalar_lea.vmem (!%p1789_p2), [#allocation4], %s1790_s12 }
 0x229   : > { %v2000_v60 = vpop.f32.mrb[0].mxu0 }
 0x22a   : > { %v1094_v63 = vadd.f32 %v2000_v60, %v921_v55  ;;  %v1029_v0 = vpop.f32.mrb[1].mxu0 }
 0x22b   : > { %v1092_v2 = vadd.f32 %v1029_v0, %v919_v58  ;;  %v2001_v3 = vpop.f32.mrb[2].mxu0 }
 0x22c   : > { %1111 = vst.msk [vmem:[#allocation3 + $0x10] sm:$0xff] %vm1108_vm5, %v1094_v63  ;;  %v1095_v4 = vadd.f32 %v2001_v3, %v922_v61  ;;  %v1032_v5 = vpop.f32.mrb[3].mxu0 }
 0x22d   : > { %1109 = vst.msk [vmem:[#allocation3] sm:$0xff] %vm1108_vm5, %v1092_v2  ;;  %v1093_v6 = vadd.f32 %v1032_v5, %v920_v1 }
 0x22e   : > { %1112 = vst.msk [vmem:[#allocation3 + $0x18] sm:$0xff] %vm1108_vm5, %v1095_v4 }
 0x22f   : > { %1110 = vst.msk [vmem:[#allocation3 + $0x8] sm:$0xff] %vm1108_vm5, %v1093_v6 }
 0x231   : > { %v2004_v9 = vpop.f32.mrb[4].mxu0 }
 0x232   : > { %v1098_v11 = vadd.f32 %v2004_v9, %v925_v7  ;;  %v1045_v12 = vpop.f32.mrb[5].mxu0 }
 0x233   : > { %v1096_v14 = vadd.f32 %v1045_v12, %v923_v8  ;;  %v2005_v15 = vpop.f32.mrb[6].mxu0  ;;  %v1180_v58 = vld [vmem:[#allocation3 + $0x10] sm:$0xff] (!%p1789_p2) }
 0x234   : > { %1115 = vst.msk [vmem:[#allocation3 + $0x30] sm:$0xff] %vm1108_vm5, %v1098_v11  ;;  %v1099_v16 = vadd.f32 %v2005_v15, %v926_v10  ;;  %v1048_v17 = vpop.f32.mrb[7].mxu0  ;;  %v1178_v48 = vld [vmem:[#allocation3] sm:$0xff] (!%p1789_p2)  ;;  %v1203_v61 = vadd.f32 (!%p1789_p2), %v1791_v49, %v1180_v58 }
 0x235   : > { %1113 = vst.msk [vmem:[#allocation3 + $0x20] sm:$0xff] %vm1108_vm5, %v1096_v14  ;;  %v1097_v18 = vadd.f32 %v1048_v17, %v924_v13  ;;  %v1201_v51 = vadd.f32 (!%p1789_p2), %v1791_v49, %v1178_v48  ;;  %v1181_v63 = vld [vmem:[#allocation3 + $0x18] sm:$0xff] (!%p1789_p2) }
 0x236   : > { %1116 = vst.msk [vmem:[#allocation3 + $0x38] sm:$0xff] %vm1108_vm5, %v1099_v16  ;;  %v1179_v53 = vld [vmem:[#allocation3 + $0x8] sm:$0xff] (!%p1789_p2)  ;;  %v1204_v6 = vadd.f32 (!%p1789_p2), %v1791_v49, %v1181_v63  ;;  %v1219_v8 = vmax.f32 (!%p1789_p2), %v1203_v61, 0.0 }
 0x237   : > { %1114 = vst.msk [vmem:[#allocation3 + $0x28] sm:$0xff] %vm1108_vm5, %v1097_v18  ;;  %v1202_v56 = vadd.f32 (!%p1789_p2), %v1791_v49, %v1179_v53  ;;  %v1217_v60 = vmax.f32 (!%p1789_p2), %v1201_v51, 0.0 }
 0x238   : > { %v1220_v16 = vmax.f32 (!%p1789_p2), %v1204_v6, 0.0 }
 0x239   : > { %v2008_v21 = vpop.f32.mrb[8].mxu0  ;;  %2042 = vmatprep.mubr.msk.f32.mxu0 (!%p1789_p2), %vm1108_vm5, %v1217_v60  ;;  %v1218_v4 = vmax.f32 (!%p1789_p2), %v1202_v56, 0.0 }
 0x23a   : > { %v1102_v23 = vadd.f32 %v2008_v21, %v929_v19  ;;  %v1061_v24 = vpop.f32.mrb[9].mxu0 }
 0x23b   : > { %v1100_v26 = vadd.f32 %v1061_v24, %v927_v20  ;;  %v2009_v27 = vpop.f32.mrb[10].mxu0  ;;  %v1184_v14 = vld [vmem:[#allocation3 + $0x30] sm:$0xff] (!%p1789_p2)  ;;  %2043 = vmatmul.mubr.msk.f32.vlgmr.msra.gmra.mrb[0].mxu0 (!%p1789_p2), %vm1108_vm5, %v1218_v4 }
 0x23c   : > { %1119 = vst.msk [vmem:[#allocation3 + $0x50] sm:$0xff] %vm1108_vm5, %v1102_v23  ;;  %v1103_v28 = vadd.f32 %v2009_v27, %v930_v22  ;;  %v1064_v29 = vpop.f32.mrb[11].mxu0  ;;  %v1182_v2 = vld [vmem:[#allocation3 + $0x20] sm:$0xff] (!%p1789_p2)  ;;  %2045 = vmatprep.mubr.msk.f32.mxu0 (!%p1789_p2), %vm1108_vm5, %v1219_v8  ;;  %v1207_v22 = vadd.f32 (!%p1789_p2), %v1791_v49, %v1184_v14 }
 0x23d   : > { %1117 = vst.msk [vmem:[#allocation3 + $0x40] sm:$0xff] %vm1108_vm5, %v1100_v26  ;;  %v1101_v30 = vadd.f32 %v1064_v29, %v928_v25  ;;  %v1205_v10 = vadd.f32 (!%p1789_p2), %v1791_v49, %v1182_v2  ;;  %v1185_v24 = vld [vmem:[#allocation3 + $0x38] sm:$0xff] (!%p1789_p2) }
 0x23e   : > { %1120 = vst.msk [vmem:[#allocation3 + $0x58] sm:$0xff] %vm1108_vm5, %v1103_v28  ;;  %v1183_v12 = vld [vmem:[#allocation3 + $0x28] sm:$0xff] (!%p1789_p2)  ;;  %v1208_v28 = vadd.f32 (!%p1789_p2), %v1791_v49, %v1185_v24 }
 0x23f   : > { %1118 = vst.msk [vmem:[#allocation3 + $0x48] sm:$0xff] %vm1108_vm5, %v1101_v30  ;;  %v1206_v18 = vadd.f32 (!%p1789_p2), %v1791_v49, %v1183_v12  ;;  %v1221_v20 = vmax.f32 (!%p1789_p2), %v1205_v10, 0.0  ;;  %2046 = vmatmul.mubr.msk.f32.gmra.mrb[2].mxu0 (!%p1789_p2), %vm1108_vm5, %v1220_v16  ;;  %v1223_v30 = vmax.f32 (!%p1789_p2), %v1207_v22, 0.0 }
 0x241   : > { %v2012_v33 = vpop.f32.mrb[12].mxu0  ;;  %1176 = sbr.rel (%p1789_p2) target bundleno = 813 (0x32d), region = 113  ;;  %v1222_v26 = vmax.f32 (!%p1789_p2), %v1206_v18, 0.0  ;;  %2048 = vmatprep.mubr.msk.f32.mxu0 (!%p1789_p2), %vm1108_vm5, %v1221_v20 }
 0x242   : > { %v1106_v35 = vadd.f32 %v2012_v33, %v933_v31  ;;  %v1077_v36 = vpop.f32.mrb[13].mxu0 }
 0x243   : > { %v1104_v38 = vadd.f32 %v1077_v36, %v931_v32  ;;  %v2013_v39 = vpop.f32.mrb[14].mxu0  ;;  %v1188_v59 = vld [vmem:[#allocation3 + $0x50] sm:$0xff] (!%p1789_p2)  ;;  %2049 = vmatmul.mubr.msk.f32.gmra.mrb[4].mxu0 (!%p1789_p2), %vm1108_vm5, %v1222_v26  ;;  %v1224_v32 = vmax.f32 (!%p1789_p2), %v1208_v28, 0.0 }
 0x244   : > { %1123 = vst.msk [vmem:[#allocation3 + $0x70] sm:$0xff] %vm1108_vm5, %v1106_v35  ;;  %v1107_v40 = vadd.f32 %v2013_v39, %v934_v34  ;;  %v1080_v41 = vpop.f32.mrb[15].mxu0  ;;  %v1186_v52 = vld [vmem:[#allocation3 + $0x40] sm:$0xff] (!%p1789_p2)  ;;  %v1211_v62 = vadd.f32 (!%p1789_p2), %v1791_v49, %v1188_v59  ;;  %2051 = vmatprep.mubr.msk.f32.mxu0 (!%p1789_p2), %vm1108_vm5, %v1223_v30 }
 0x245   : > { %1121 = vst.msk [vmem:[#allocation3 + $0x60] sm:$0xff] %vm1108_vm5, %v1104_v38  ;;  %v1105_v42 = vadd.f32 %v1080_v41, %v932_v37  ;;  %v1209_v55 = vadd.f32 (!%p1789_p2), %v1791_v49, %v1186_v52  ;;  %v1189_v0 = vld [vmem:[#allocation3 + $0x58] sm:$0xff] (!%p1789_p2) }
 0x246   : > { %1124 = vst.msk [vmem:[#allocation3 + $0x78] sm:$0xff] %vm1108_vm5, %v1107_v40  ;;  %v1187_v54 = vld [vmem:[#allocation3 + $0x48] sm:$0xff] (!%p1789_p2)  ;;  %v1212_v7 = vadd.f32 (!%p1789_p2), %v1791_v49, %v1189_v0  ;;  %v1227_v9 = vmax.f32 (!%p1789_p2), %v1211_v62, 0.0 }
 0x247   : > { %1122 = vst.msk [vmem:[#allocation3 + $0x68] sm:$0xff] %vm1108_vm5, %v1105_v42  ;;  %v1210_v57 = vadd.f32 (!%p1789_p2), %v1791_v49, %v1187_v54  ;;  %v1225_v1 = vmax.f32 (!%p1789_p2), %v1209_v55, 0.0  ;;  %2052 = vmatmul.mubr.msk.f32.gmra.mrb[6].mxu0 (!%p1789_p2), %vm1108_vm5, %v1224_v32 }
 0x248   : > { %v1228_v17 = vmax.f32 %v1212_v7, 0.0 }
 0x249   : > { %2054 = vmatprep.mubr.msk.f32.mxu1 %vm1108_vm5, %v1225_v1  ;;  %v1226_v5 = vmax.f32 %v1210_v57, 0.0 }
 0x24b   : > { %v1192_v15 = vld [vmem:[#allocation3 + $0x70] sm:$0xff]  ;;  %2055 = vmatmul.mubr.msk.f32.vlgmr.msra.gmra.mrb[0].mxu1 %vm1108_vm5, %v1226_v5 }
 0x24c   : > { %v1190_v3 = vld [vmem:[#allocation3 + $0x60] sm:$0xff]  ;;  %2057 = vmatprep.mubr.msk.f32.mxu1 %vm1108_vm5, %v1227_v9  ;;  %v1215_v23 = vadd.f32 %v1791_v49, %v1192_v15 }
 0x24d   : > { %v1213_v11 = vadd.f32 %v1791_v49, %v1190_v3  ;;  %v1193_v25 = vld [vmem:[#allocation3 + $0x78] sm:$0xff] }
 0x24e   : > { %v1191_v13 = vld [vmem:[#allocation3 + $0x68] sm:$0xff]  ;;  %v1216_v29 = vadd.f32 %v1791_v49, %v1193_v25  ;;  %v1231_v31 = vmax.f32 %v1215_v23, 0.0 }
 0x24f   : > { %v1214_v19 = vadd.f32 %v1791_v49, %v1191_v13  ;;  %v1229_v21 = vmax.f32 %v1213_v11, 0.0  ;;  %2058 = vmatmul.mubr.msk.f32.gmra.mrb[2].mxu1 %vm1108_vm5, %v1228_v17 }
 0x250   : > { %v1232_v33 = vmax.f32 %v1216_v29, 0.0 }
 0x251   : > { %v1230_v27 = vmax.f32 %v1214_v19, 0.0  ;;  %2060 = vmatprep.mubr.msk.f32.mxu1 %vm1108_vm5, %v1229_v21 }
 0x253   : > { %2061 = vmatmul.mubr.msk.f32.gmra.mrb[4].mxu1 %vm1108_vm5, %v1230_v27 }
 0x254   : > { %2063 = vmatprep.mubr.msk.f32.mxu1 %vm1108_vm5, %v1231_v31 }
 0x257   : > { %2064 = vmatmul.mubr.msk.f32.gmra.mrb[6].mxu1 %vm1108_vm5, %v1232_v33 }
 0x30e   : > { %v2044_v34 = vpop.f32.mrb[0].mxu0 }
 0x30f   : > { %1432 = vst.msk [vmem:[%s1430_s22 + $0x8] sm:$0xff] %vm1108_vm5, %v2044_v34  ;;  %v1351_v36 = vpop.f32.mrb[1].mxu0 }
 0x310   : > { %1431 = vst.msk [vmem:[%s1430_s22] sm:$0xff] %vm1108_vm5, %v1351_v36 }
 0x312   : > { %v2047_v38 = vpop.f32.mrb[2].mxu0 }
 0x313   : > { %1434 = vst.msk [vmem:[%s1430_s22 + $0x18] sm:$0xff] %vm1108_vm5, %v2047_v38  ;;  %v1361_v40 = vpop.f32.mrb[3].mxu0 }
 0x314   : > { %1433 = vst.msk [vmem:[%s1430_s22 + $0x10] sm:$0xff] %vm1108_vm5, %v1361_v40 }
 0x316   : > { %v2050_v42 = vpop.f32.mrb[4].mxu0 }
 0x317   : > { %1436 = vst.msk [vmem:[%s1430_s22 + $0x28] sm:$0xff] %vm1108_vm5, %v2050_v42  ;;  %v1371_v44 = vpop.f32.mrb[5].mxu0 }
 0x318   : > { %1435 = vst.msk [vmem:[%s1430_s22 + $0x20] sm:$0xff] %vm1108_vm5, %v1371_v44 }
 0x31a   : > { %v2053_v46 = vpop.f32.mrb[6].mxu0 }
 0x31b   : > { %1438 = vst.msk [vmem:[%s1430_s22 + $0x38] sm:$0xff] %vm1108_vm5, %v2053_v46  ;;  %v1381_v48 = vpop.f32.mrb[7].mxu0 }
 0x31c   : > { %1437 = vst.msk [vmem:[%s1430_s22 + $0x30] sm:$0xff] %vm1108_vm5, %v1381_v48 }
 0x31e   : > { %v2056_v35 = vpop.f32.mrb[0].mxu1 }
 0x31f   : > { %1440 = vst.msk [vmem:[%s1430_s22 + $0x48] sm:$0xff] %vm1108_vm5, %v2056_v35  ;;  %v1391_v37 = vpop.f32.mrb[1].mxu1 }
 0x320   : > { %1439 = vst.msk [vmem:[%s1430_s22 + $0x40] sm:$0xff] %vm1108_vm5, %v1391_v37 }
 0x322   : > { %v2059_v39 = vpop.f32.mrb[2].mxu1 }
 0x323   : > { %1442 = vst.msk [vmem:[%s1430_s22 + $0x58] sm:$0xff] %vm1108_vm5, %v2059_v39  ;;  %v1401_v41 = vpop.f32.mrb[3].mxu1 }
 0x324   : > { %1441 = vst.msk [vmem:[%s1430_s22 + $0x50] sm:$0xff] %vm1108_vm5, %v1401_v41 }
 0x326   : > { %v2062_v43 = vpop.f32.mrb[4].mxu1 }
 0x327   : > { %1444 = vst.msk [vmem:[%s1430_s22 + $0x68] sm:$0xff] %vm1108_vm5, %v2062_v43  ;;  %v1411_v45 = vpop.f32.mrb[5].mxu1 }
 0x328   : > { %1443 = vst.msk [vmem:[%s1430_s22 + $0x60] sm:$0xff] %vm1108_vm5, %v1411_v45 }
 0x32a   : > { %v2065_v47 = vpop.f32.mrb[6].mxu1 }
 0x32b   : > { %1446 = vst.msk [vmem:[%s1430_s22 + $0x78] sm:$0xff] %vm1108_vm5, %v2065_v47  ;;  %v1421_v49 = vpop.f32.mrb[7].mxu1 }
 0x32c   : > { %1445 = vst.msk [vmem:[%s1430_s22 + $0x70] sm:$0xff] %vm1108_vm5, %v1421_v49 }
 0x32d PF: > { %p1447_p3 = scmp.eq.s32.totalorder %s2248_s16, 1 }
 0x32f   : > { %p1448_p4 = pnand %p1447_p3, %p1173_p1 }
 0x330   : > { %v2266_v57 = vmov (!%p1448_p4), 0   ;;  %v1453_v12 = vld [vmem:[#allocation5 + $0x8] sm:$0xff] (!%p1448_p4)  ;;  %v1556_v13 = vld [vmem:[%s2732_s9] sm:$0xff] (!%p1448_p4)  ;;  %v2267_v41 = vmov (!%p1448_p4), 0.0|0.0   ;;  %v1573_v42 = vld [vmem:[%s2730_s7 + $0x10] sm:$0xff] (!%p1448_p4)  ;;  %vm2268_vm6 = vmmov (!%p1448_p4), 0  }
 0x331   : > { %1451 = sbr.rel (%p1448_p4) target bundleno = 1604 (0x644), region = 117  ;;  %2201 = vset.pattern.permute.xlu0 (!%p1448_p4), %v2266_v57  ;;  %1550 = vmatprep.mubr.f32.mxu0 (!%p1448_p4), %v1453_v12  ;;  %v1452_v37 = vld [vmem:[#allocation5] sm:$0xff] (!%p1448_p4)  ;;  %v1572_v39 = vld [vmem:[%s2730_s7 + $0x8] sm:$0xff] (!%p1448_p4)  ;;  %v1574_v43 = vld [vmem:[%s2730_s7 + $0x18] sm:$0xff] (!%p1448_p4)  ;;  %v2269_v45 = vmov (!%p1448_p4), 0.0   ;;  %vm1655_vm7 = vcmask (!%p1448_p4), 31744  }
 0x332   : > { %1559 = vperm.xlu0 (!%p1448_p4), %2201, %v1556_v13   ;;  %v1571_v38 = vld [vmem:[%s2730_s7] sm:$0xff] (!%p1448_p4)  ;;  %2117 = vmatprep.subr.bf16.mxu1 (!%p1448_p4), %v2267_v41  ;;  %v2121_v44 = vpack.c.bf16 (!%p1448_p4), %v1574_v43, %v1573_v42 }
 0x333   : > { %v1470_v50 = vld [vmem:[#allocation4 + $0x80] sm:$0xff] (!%p1448_p4)  ;;  %v1471_v51 = vld [vmem:[#allocation4 + $0x88] sm:$0xff] (!%p1448_p4)  ;;  %v1472_v55 = vld [vmem:[#allocation4 + $0x90] sm:$0xff] (!%p1448_p4)  ;;  %v2118_v40 = vpack.c.bf16 (!%p1448_p4), %v1572_v39, %v1571_v38  ;;  %2074 = vmatprep.mubr.msk.f32.mxu1 (!%p1448_p4), %vm2268_vm6, %v2269_v45 }
 0x334   : > { %v1454_v52 = vld [vmem:[#allocation4] sm:$0xff] (!%p1448_p4)  ;;  %v2085_v53 = vpack.c.bf16 (!%p1448_p4), %v1471_v51, %v1470_v50  ;;  %v1455_v54 = vld [vmem:[#allocation4 + $0x8] sm:$0xff] (!%p1448_p4)  ;;  %v1473_v56 = vld [vmem:[#allocation4 + $0x98] sm:$0xff] (!%p1448_p4) }
 0x335   : > { %v2087_v58 = vpack.c.bf16 (!%p1448_p4), %v1455_v54, %v1454_v52  ;;  %v2089_v59 = vpack.c.bf16 (!%p1448_p4), %v1473_v56, %v1472_v55  ;;  %v1456_v60 = vld [vmem:[#allocation4 + $0x10] sm:$0xff] (!%p1448_p4)  ;;  %v1457_v61 = vld [vmem:[#allocation4 + $0x18] sm:$0xff] (!%p1448_p4)  ;;  %v1474_v62 = vld [vmem:[#allocation4 + $0xa0] sm:$0xff] (!%p1448_p4)  ;;  %2119 = vmatpush3.bf16.msra.mxu1 (!%p1448_p4), %v2118_v40 }
 0x336   : > { %2086 = vmatprep.subr.bf16.mxu0 (!%p1448_p4), %v2085_v53  ;;  %v1475_v63 = vld [vmem:[#allocation4 + $0xa8] sm:$0xff] (!%p1448_p4)  ;;  %v2091_v0 = vpack.c.bf16 (!%p1448_p4), %v1457_v61, %v1456_v60  ;;  %v1458_v2 = vld [vmem:[#allocation4 + $0x20] sm:$0xff] (!%p1448_p4)  ;;  %v1476_v4 = vld [vmem:[#allocation4 + $0xb0] sm:$0xff] (!%p1448_p4)  ;;  %2120 = vmatprep.subr.bf16.mxu1 (!%p1448_p4), %v2267_v41 }
 0x337   : > { %2088 = vmatpush3.bf16.msra.mxu0 (!%p1448_p4), %v2087_v58  ;;  %v2093_v1 = vpack.c.bf16 (!%p1448_p4), %v1475_v63, %v1474_v62  ;;  %v1459_v3 = vld [vmem:[#allocation4 + $0x28] sm:$0xff] (!%p1448_p4)  ;;  %v1477_v5 = vld [vmem:[#allocation4 + $0xb8] sm:$0xff] (!%p1448_p4)  ;;  %v1460_v8 = vld [vmem:[#allocation4 + $0x30] sm:$0xff] (!%p1448_p4) }
 0x338   : > { %2090 = vmatprep.subr.bf16.mxu0 %v2089_v59  ;;  %v2095_v6 = vpack.c.bf16 %v1459_v3, %v1458_v2  ;;  %v2097_v7 = vpack.c.bf16 %v1477_v5, %v1476_v4  ;;  %v1461_v9 = vld [vmem:[#allocation4 + $0x38] sm:$0xff]  ;;  %v1478_v10 = vld [vmem:[#allocation4 + $0xc0] sm:$0xff]  ;;  %v1479_v11 = vld [vmem:[#allocation4 + $0xc8] sm:$0xff] }
 0x339   : > { %v2099_v14 = vpack.c.bf16 %v1461_v9, %v1460_v8  ;;  %v2101_v15 = vpack.c.bf16 %v1479_v11, %v1478_v10  ;;  %v1462_v16 = vld [vmem:[#allocation4 + $0x40] sm:$0xff]  ;;  %v1463_v17 = vld [vmem:[#allocation4 + $0x48] sm:$0xff]  ;;  %v1480_v18 = vld [vmem:[#allocation4 + $0xd0] sm:$0xff]  ;;  %2122 = vmatpush3.bf16.msra.mxu1 %v2121_v44 }
 0x33a   : > { %v1481_v19 = vld [vmem:[#allocation4 + $0xd8] sm:$0xff]  ;;  %v2103_v20 = vpack.c.bf16 %v1463_v17, %v1462_v16  ;;  %v1464_v22 = vld [vmem:[#allocation4 + $0x50] sm:$0xff]  ;;  %v1482_v24 = vld [vmem:[#allocation4 + $0xe0] sm:$0xff] }
 0x33b   : > { %2092 = vmatpush3.bf16.msra.mxu0 %v2091_v0  ;;  %v2105_v21 = vpack.c.bf16 %v1481_v19, %v1480_v18  ;;  %v1465_v23 = vld [vmem:[#allocation4 + $0x58] sm:$0xff]  ;;  %v1483_v25 = vld [vmem:[#allocation4 + $0xe8] sm:$0xff]  ;;  %v1466_v28 = vld [vmem:[#allocation4 + $0x60] sm:$0xff] }
 0x33c   : > { %2094 = vmatprep.subr.bf16.mxu0 %v2093_v1  ;;  %v2107_v26 = vpack.c.bf16 %v1465_v23, %v1464_v22  ;;  %v2109_v27 = vpack.c.bf16 %v1483_v25, %v1482_v24  ;;  %v1467_v29 = vld [vmem:[#allocation4 + $0x68] sm:$0xff]  ;;  %v1484_v30 = vld [vmem:[#allocation4 + $0xf0] sm:$0xff]  ;;  %v1485_v31 = vld [vmem:[#allocation4 + $0xf8] sm:$0xff] }
 0x33d   : > { %v2111_v32 = vpack.c.bf16 %v1467_v29, %v1466_v28  ;;  %v2113_v33 = vpack.c.bf16 %v1485_v31, %v1484_v30  ;;  %v1468_v34 = vld [vmem:[#allocation4 + $0x70] sm:$0xff]  ;;  %v1469_v35 = vld [vmem:[#allocation4 + $0x78] sm:$0xff]  ;;  %v1808_v50 = vld [vmem:[%s2729_s6] ss:$0 sm:$0xff] }
 0x33e   : > { %v2115_v36 = vpack.c.bf16 %v1469_v35, %v1468_v34  ;;  %v1809_v53 = vld [vmem:[%s2731_s8] ss:$0 sm:$0xff] }
 0x33f   : > { %2096 = vmatpush3.bf16.msra.mxu0 %v2095_v6 }
 0x340   : > { %2098 = vmatprep.subr.bf16.mxu0 %v2097_v7 }
 0x343   : > { %2100 = vmatpush3.bf16.msra.mxu0 %v2099_v14 }
 0x344   : > { %2102 = vmatprep.subr.bf16.mxu0 %v2101_v15 }
 0x347   : > { %2104 = vmatpush3.bf16.msra.mxu0 %v2103_v20 }
 0x348   : > { %2106 = vmatprep.subr.bf16.mxu0 %v2105_v21 }
 0x34b   : > { %2108 = vmatpush3.bf16.msra.mxu0 %v2107_v26 }
 0x34c   : > { %2110 = vmatprep.subr.bf16.mxu0 %v2109_v27 }
 0x34f   : > { %2112 = vmatpush3.bf16.msra.mxu0 %v2111_v32 }
 0x350   : > { %2114 = vmatprep.subr.bf16.mxu0 %v2113_v33 }
 0x353   : > { %2116 = vmatpush3.bf16.msra.mxu0 %v2115_v36 }
 0x356   : > { %1551 = vmatmul.mubr.f32.vlgmr.msra.gmra.mrb[0].mxu0 %v1452_v37 }
 0x3b1   : > { %v1560_v48 = vpop.permute.xlu0 %1559 }
 0x429   : > { %v1924_v46 = vpop.f32.mrb[0].mxu0 }
 0x42a   : > { %v1925_v47 = vpop.f32.mrb[1].mxu0 }
 0x42b   : > { %v1926_v49 = vadd.f32 %v1925_v47, %v1924_v46 }
 0x42d   : > { %v1562_v51 = vmul.f32 %v1926_v49, %v1560_v48 }
 0x42f   : > { %v1570_v52 = vadd.f32 %v1808_v50, %v1562_v51 }
 0x431   : > { %2075 = vmatmul.mubr.msk.f32.vlgmr.msra.gmra.mrb[0].mxu1 %vm1108_vm5, %v1570_v52 }
 0x504   : > { %v1651_v54 = vpop.f32.mrb[0].mxu1 }
 0x505   : > { %v1652_v55 = vadd.f32 %v1809_v53, %v1651_v54  ;;  %v2076_v56 = vpop.f32.mrb[1].mxu1 }
 0x507   : > { %v1656_v57 = vsel %vm1655_vm7, %v1652_v55, -inf }
 0x508   : > { %1657 = vmax.xlane.f32.xlu0 %v1656_v57 }
 0x595   : > { %v1658_v58 = vpop.xlane.xlu0 %1657 }
 0x596   : > { %v1659_v59 = vsub.f32 %v1652_v55, %v1658_v58 }
 0x598   : > { %v1660_v60 = vmul.f32 1.442695, %v1659_v59 }
 0x59a   : > { %2202 = vpow2.f32 %v1660_v60 }
 0x5a4   : > { %v2203_v61 = vpop.eup %2202 }
 0x5a5   : > { %v1662_v62 = vsel %vm1655_vm7, %v2203_v61, 0.0 }
 0x5a6   : > { %1663 = vadd.xlane.f32.xlu1 %v1662_v62 }
 0x633   : > { %v1664_v63 = vpop.xlane.xlu1 %1663 }
 0x634   : > { %2204 = vlog2.f32 %v1664_v63 }
 0x63e   : > { %v2205_v0 = vpop.eup %2204 }
 0x63f   : > { %v1666_v1 = vmul.f32 0.6931472, %v2205_v0 }
 0x641   : > { %v1667_v2 = vsub.f32 %v1659_v59, %v1666_v1 }
 0x643   : > { %1668 = vst.msk [vmem:[%s2733_s10] sm:$0xff] %vm1655_vm7, %v1667_v2 }
 0x644 PF: > { %s20_s19 = sadd.s32 1, %s2260_s19   ;;  %s2736_s30 = sld [smem:[#allocation7_spill]] }
 0x645   : > { %p17_p5 = scmp.ge.s32.totalorder %s20_s19, 6   ;;  %s2737_s13 = smov %s2240_s14 }
 0x646   : > { %s2738_s14 = smov %s2376_s26  ;;  %s2739_s15 = smov %s2252_s17 }
 0x647   : > { %s2740_s16 = smov %s2256_s18  ;;  %s2742_s18 = smov %s2748_s21 }
 0x648   :  { %19 = sbr.rel (!%p17_p5) target bundleno = 4 (0x4), region = 154 }
 0x64a   : > { %s2741_s17 = smov %s2736_s30 }

</bundles_post_ra>
